<compile_context>
chip_gen: v7x
topology: tpu7x:2x2x1
jax: 0.10.0
libtpu: 0.0.40
codegen_flags: <defaults>
</compile_context>

<pallas_src>
import functools
import math

import jax
import jax.numpy as jnp
from jax.experimental import pallas as pl
from jax.experimental.pallas import tpu as pltpu


CFG = dict(vocab=100, hidden=32, layers=2, heads=4, head_dim=8,
           inter=64, max_pos=16, type_vocab=2, labels=2, ln_eps=1e-12)


def _gelu(x):
    # tanh-approx GELU in f32; HF ELECTRA default 'gelu' is erf-based.
    # TODO(synk): switch to exact erf GELU if bit-matching HF is required.
    c = math.sqrt(2.0 / math.pi)
    return 0.5 * x * (1.0 + jnp.tanh(c * (x + 0.044715 * x * x * x)))


# --------------------------- fused forward kernel ---------------------------

def _fused_electra_kernel(
        emb_ref, mask_ref,
        emb_g_ref, emb_b_ref,
        wqkv_ref, bqkv_ref, wo_ref, bo_ref, ln1_g_ref, ln1_b_ref,
        wi_ref, bi_ref, wo2_ref, bo2_ref, ln2_g_ref, ln2_b_ref,
        cls_w_ref, cls_b_ref, out_w_ref, out_b_ref,
        probs_ref,
        *, num_layers, num_heads, head_dim, eps):
    """One grid step = one batch element.  Everything stays resident in VMEM."""

    def ln(x, g, b):
        mu = jnp.mean(x, axis=-1, keepdims=True)
        var = jnp.mean((x - mu) ** 2, axis=-1, keepdims=True)
        return (x - mu) * jax.lax.rsqrt(var + eps) * g + b

    def mm(x, w):  # bf16 MXU inputs, f32 accumulation
        return jnp.dot(x.astype(jnp.bfloat16), w,
                       preferred_element_type=jnp.float32)

    x = emb_ref[0]                                   # (S, H) f32
    _, H = x.shape
    x = ln(x, emb_g_ref[...], emb_b_ref[...])        # embedding LayerNorm

    # HF extended attention mask: (1 - mask) * -10000, computed in-kernel.
    bias = (1.0 - mask_ref[0]) * -10000.0            # (1, S)
    scale = 1.0 / math.sqrt(head_dim)

    for l in range(num_layers):                      # static, unrolled
        # ---- self-attention (fused QKV: one (S,H) @ (H,3H) matmul) ----
        qkv = mm(x, wqkv_ref[l]) + bqkv_ref[l]       # (S, 3H) f32

        ctx_heads = []
        for h in range(num_heads):                   # heads sliced on lanes
            lo = h * head_dim
            qh = qkv[:, lo:lo + head_dim]
            kh = qkv[:, H + lo:H + lo + head_dim]
            vh = qkv[:, 2 * H + lo:2 * H + lo + head_dim]
            s = jax.lax.dot_general(
                qh.astype(jnp.bfloat16), kh.astype(jnp.bfloat16),
                dimension_numbers=(((1,), (1,)), ((), ())),
                preferred_element_type=jnp.float32)   # (S, S) = q @ k^T
            s = s * scale + bias
            s = s - jnp.max(s, axis=-1, keepdims=True)
            p = jnp.exp(s)
            p = p / jnp.sum(p, axis=-1, keepdims=True)
            ctx_heads.append(
                jnp.dot(p.astype(jnp.bfloat16), vh.astype(jnp.bfloat16),
                        preferred_element_type=jnp.float32))   # (S, Dh)
        ctx = jnp.concatenate(ctx_heads, axis=-1)    # (S, H)

        attn_out = mm(ctx, wo_ref[l]) + bo_ref[l]
        x = ln(x + attn_out, ln1_g_ref[l], ln1_b_ref[l])   # residual fused

        # ---- feed-forward ----
        inter = _gelu(mm(x, wi_ref[l]) + bi_ref[l])  # (S, I)
        ffn = mm(inter, wo2_ref[l]) + bo2_ref[l]     # (S, H)
        x = ln(x + ffn, ln2_g_ref[l], ln2_b_ref[l])  # residual fused

    # ---- ElectraClassificationHead: [CLS], dense+gelu, out_proj ----
    cls = x[0:1, :]                                  # (1, H)
    z = _gelu(mm(cls, cls_w_ref[...]) + cls_b_ref[...])
    logits = mm(z, out_w_ref[...]) + out_b_ref[...]  # (1, labels)

    # ---- nn.Softmax(dim=1) over labels ----
    logits = logits - jnp.max(logits, axis=-1, keepdims=True)
    e = jnp.exp(logits)
    probs_ref[0] = (e / jnp.sum(e, axis=-1, keepdims=True)).astype(probs_ref.dtype)


# ------------------------- synthetic ELECTRA params -------------------------

def init_params(key, cfg):
    H, I, NL = cfg["hidden"], cfg["inter"], cfg["layers"]
    Lbl = cfg["labels"]

    def nrm(k, shape):
        return 0.02 * jax.random.normal(k, shape, dtype=jnp.float32)

    keys = iter(jax.random.split(key, 16 + 4 * NL))
    params = {
        "word_emb": nrm(next(keys), (cfg["vocab"], H)),
        "pos_emb": nrm(next(keys), (cfg["max_pos"], H)),
        "type_emb": nrm(next(keys), (cfg["type_vocab"], H)),
        "emb_ln_g": jnp.ones((1, H), jnp.float32),
        "emb_ln_b": jnp.zeros((1, H), jnp.float32),
        # classification head (matmul weights kept in bf16 for the MXU)
        "cls_dense_w": nrm(next(keys), (H, H)).astype(jnp.bfloat16),
        "cls_dense_b": jnp.zeros((1, H), jnp.float32),
        "cls_out_w": nrm(next(keys), (H, Lbl)).astype(jnp.bfloat16),
        "cls_out_b": jnp.zeros((1, Lbl), jnp.float32),
    }

    wqkv, wo, wi, wo2 = [], [], [], []
    for _ in range(NL):
        wqkv.append(nrm(next(keys), (H, 3 * H)))     # packed Q|K|V
        wo.append(nrm(next(keys), (H, H)))
        wi.append(nrm(next(keys), (H, I)))
        wo2.append(nrm(next(keys), (I, H)))

    params.update(
        wqkv=jnp.stack(wqkv).astype(jnp.bfloat16),
        bqkv=jnp.zeros((NL, 1, 3 * H), jnp.float32),
        wo=jnp.stack(wo).astype(jnp.bfloat16),
        bo=jnp.zeros((NL, 1, H), jnp.float32),
        ln1_g=jnp.ones((NL, 1, H), jnp.float32),
        ln1_b=jnp.zeros((NL, 1, H), jnp.float32),
        wi=jnp.stack(wi).astype(jnp.bfloat16),
        bi=jnp.zeros((NL, 1, I), jnp.float32),
        wo2=jnp.stack(wo2).astype(jnp.bfloat16),
        bo2=jnp.zeros((NL, 1, H), jnp.float32),
        ln2_g=jnp.ones((NL, 1, H), jnp.float32),
        ln2_b=jnp.zeros((NL, 1, H), jnp.float32),
    )
    return params


# --------------------------------- forward ----------------------------------

def electra_bad_classifier_forward(params, input_ids, attention_mask):
    """Equivalent of ElectraBadClassifier.forward (inference, no dropout)."""
    cfg = CFG
    B, S = input_ids.shape
    H, NL = cfg["hidden"], cfg["layers"]
    nH, Dh = cfg["heads"], cfg["head_dim"]
    I, Lbl = cfg["inter"], cfg["labels"]

    # Embedding gather + sum stays in JAX glue; everything else is one kernel.
    word = jnp.take(params["word_emb"], input_ids, axis=0)        # (B,S,H)
    pos = params["pos_emb"][:S][None, :, :]                       # (1,S,H)
    tok = params["type_emb"][0][None, None, :]                    # token_type_ids=0
    emb = word + pos + tok                                        # (B,S,H) f32

    mask_f = attention_mask.astype(jnp.float32).reshape(B, 1, S)

    kernel = functools.partial(
        _fused_electra_kernel,
        num_layers=NL, num_heads=nH, head_dim=Dh, eps=cfg["ln_eps"])

    probs3 = pl.pallas_call(
        kernel,
        out_shape=jax.ShapeDtypeStruct((B, 1, Lbl), jnp.float32),
        grid=(B,),
        in_specs=[
            pl.BlockSpec((1, S, H), lambda b: (b, 0, 0)),        # emb
            pl.BlockSpec((1, 1, S), lambda b: (b, 0, 0)),        # mask
            pl.BlockSpec((1, H), lambda b: (0, 0)),              # emb_ln_g
            pl.BlockSpec((1, H), lambda b: (0, 0)),              # emb_ln_b
            pl.BlockSpec((NL, H, 3 * H), lambda b: (0, 0, 0)),   # wqkv
            pl.BlockSpec((NL, 1, 3 * H), lambda b: (0, 0, 0)),   # bqkv
            pl.BlockSpec((NL, H, H), lambda b: (0, 0, 0)),       # wo
            pl.BlockSpec((NL, 1, H), lambda b: (0, 0, 0)),       # bo
            pl.BlockSpec((NL, 1, H), lambda b: (0, 0, 0)),       # ln1_g
            pl.BlockSpec((NL, 1, H), lambda b: (0, 0, 0)),       # ln1_b
            pl.BlockSpec((NL, H, I), lambda b: (0, 0, 0)),       # wi
            pl.BlockSpec((NL, 1, I), lambda b: (0, 0, 0)),       # bi
            pl.BlockSpec((NL, I, H), lambda b: (0, 0, 0)),       # wo2
            pl.BlockSpec((NL, 1, H), lambda b: (0, 0, 0)),       # bo2
            pl.BlockSpec((NL, 1, H), lambda b: (0, 0, 0)),       # ln2_g
            pl.BlockSpec((NL, 1, H), lambda b: (0, 0, 0)),       # ln2_b
            pl.BlockSpec((H, H), lambda b: (0, 0)),              # cls_dense_w
            pl.BlockSpec((1, H), lambda b: (0, 0)),              # cls_dense_b
            pl.BlockSpec((H, Lbl), lambda b: (0, 0)),            # cls_out_w
            pl.BlockSpec((1, Lbl), lambda b: (0, 0)),            # cls_out_b
        ],
        out_specs=pl.BlockSpec((1, 1, Lbl), lambda b: (b, 0, 0)),
        compiler_params=pltpu.CompilerParams(
            dimension_semantics=("parallel",)),                  # v7x: 2 TCs
    )(emb, mask_f,
      params["emb_ln_g"], params["emb_ln_b"],
      params["wqkv"], params["bqkv"], params["wo"], params["bo"],
      params["ln1_g"], params["ln1_b"],
      params["wi"], params["bi"], params["wo2"], params["bo2"],
      params["ln2_g"], params["ln2_b"],
      params["cls_dense_w"], params["cls_dense_b"],
      params["cls_out_w"], params["cls_out_b"])

    return probs3.reshape(B, Lbl)


# ----------------------------------- main ------------------------------------

if __name__ == "__main__":
    key = jax.random.PRNGKey(0)
    pkey, ikey = jax.random.split(key)

    params = init_params(pkey, CFG)

    B, S = 2, 8
    input_ids = jax.random.randint(ikey, (B, S), 0, CFG["vocab"], dtype=jnp.int32)
    attention_mask = jnp.array(
        [[1, 1, 1, 1, 1, 1, 1, 1],
         [1, 1, 1, 1, 1, 0, 0, 0]], dtype=jnp.int32)

    fwd = jax.jit(electra_bad_classifier_forward)
    probs = jax.block_until_ready(fwd(params, input_ids, attention_mask))

    assert probs.shape == (B, CFG["labels"])
    assert bool(jnp.allclose(jnp.sum(probs, axis=1), 1.0, atol=1e-5))
    print("KERNEL_OK")
</pallas_src>

<mosaic_0001>
module attributes {stable_mosaic.version = 11 : i64} {
  func.func @_fused_electra_kernel(%arg0: i32, %arg1: memref<1x8x32xf32, #tpu.memory_space<vmem>>, %arg2: memref<1x1x8xf32, #tpu.memory_space<vmem>>, %arg3: memref<1x32xf32, #tpu.memory_space<vmem>>, %arg4: memref<1x32xf32, #tpu.memory_space<vmem>>, %arg5: memref<2x32x96xbf16, #tpu.memory_space<vmem>>, %arg6: memref<2x1x96xf32, #tpu.memory_space<vmem>>, %arg7: memref<2x32x32xbf16, #tpu.memory_space<vmem>>, %arg8: memref<2x1x32xf32, #tpu.memory_space<vmem>>, %arg9: memref<2x1x32xf32, #tpu.memory_space<vmem>>, %arg10: memref<2x1x32xf32, #tpu.memory_space<vmem>>, %arg11: memref<2x32x64xbf16, #tpu.memory_space<vmem>>, %arg12: memref<2x1x64xf32, #tpu.memory_space<vmem>>, %arg13: memref<2x64x32xbf16, #tpu.memory_space<vmem>>, %arg14: memref<2x1x32xf32, #tpu.memory_space<vmem>>, %arg15: memref<2x1x32xf32, #tpu.memory_space<vmem>>, %arg16: memref<2x1x32xf32, #tpu.memory_space<vmem>>, %arg17: memref<32x32xbf16, #tpu.memory_space<vmem>>, %arg18: memref<1x32xf32, #tpu.memory_space<vmem>>, %arg19: memref<32x2xbf16, #tpu.memory_space<vmem>>, %arg20: memref<1x2xf32, #tpu.memory_space<vmem>>, %arg21: memref<1x1x2xf32, #tpu.memory_space<vmem>>) attributes {dimension_semantics = [#tpu.dimension_semantics<parallel>], iteration_bounds = array<i64: 2>, scalar_prefetch = 0 : i64, scratch_operands = 0 : i64, tpu.core_type = #tpu.core_type<tc>, window_params = [{transform_indices = @transform_0, window_bounds = array<i64: 1, 8, 32>}, {transform_indices = @transform_1, window_bounds = array<i64: 1, 1, 8>}, {pipeline_mode = #tpu.pipeline_mode<synchronous>, transform_indices = @transform_2, window_bounds = array<i64: 1, 32>}, {pipeline_mode = #tpu.pipeline_mode<synchronous>, transform_indices = @transform_3, window_bounds = array<i64: 1, 32>}, {pipeline_mode = #tpu.pipeline_mode<synchronous>, transform_indices = @transform_4, window_bounds = array<i64: 2, 32, 96>}, {pipeline_mode = #tpu.pipeline_mode<synchronous>, transform_indices = @transform_5, window_bounds = array<i64: 2, 1, 96>}, {pipeline_mode = #tpu.pipeline_mode<synchronous>, transform_indices = @transform_6, window_bounds = array<i64: 2, 32, 32>}, {pipeline_mode = #tpu.pipeline_mode<synchronous>, transform_indices = @transform_7, window_bounds = array<i64: 2, 1, 32>}, {pipeline_mode = #tpu.pipeline_mode<synchronous>, transform_indices = @transform_8, window_bounds = array<i64: 2, 1, 32>}, {pipeline_mode = #tpu.pipeline_mode<synchronous>, transform_indices = @transform_9, window_bounds = array<i64: 2, 1, 32>}, {pipeline_mode = #tpu.pipeline_mode<synchronous>, transform_indices = @transform_10, window_bounds = array<i64: 2, 32, 64>}, {pipeline_mode = #tpu.pipeline_mode<synchronous>, transform_indices = @transform_11, window_bounds = array<i64: 2, 1, 64>}, {pipeline_mode = #tpu.pipeline_mode<synchronous>, transform_indices = @transform_12, window_bounds = array<i64: 2, 64, 32>}, {pipeline_mode = #tpu.pipeline_mode<synchronous>, transform_indices = @transform_13, window_bounds = array<i64: 2, 1, 32>}, {pipeline_mode = #tpu.pipeline_mode<synchronous>, transform_indices = @transform_14, window_bounds = array<i64: 2, 1, 32>}, {pipeline_mode = #tpu.pipeline_mode<synchronous>, transform_indices = @transform_15, window_bounds = array<i64: 2, 1, 32>}, {pipeline_mode = #tpu.pipeline_mode<synchronous>, transform_indices = @transform_16, window_bounds = array<i64: 32, 32>}, {pipeline_mode = #tpu.pipeline_mode<synchronous>, transform_indices = @transform_17, window_bounds = array<i64: 1, 32>}, {pipeline_mode = #tpu.pipeline_mode<synchronous>, transform_indices = @transform_18, window_bounds = array<i64: 32, 2>}, {pipeline_mode = #tpu.pipeline_mode<synchronous>, transform_indices = @transform_19, window_bounds = array<i64: 1, 2>}, {transform_indices = @transform_20, window_bounds = array<i64: 1, 1, 2>}]} {
    %c0 = arith.constant 0 : index
    %c0_0 = arith.constant 0 : index
    %c0_1 = arith.constant 0 : index
    %0 = vector.load %arg1[%c0, %c0_0, %c0_1] : memref<1x8x32xf32, #tpu.memory_space<vmem>>, vector<1x8x32xf32>
    %1 = vector.shape_cast %0 : vector<1x8x32xf32> to vector<8x32xf32>
    %c0_2 = arith.constant 0 : index
    %c0_3 = arith.constant 0 : index
    %2 = vector.load %arg3[%c0_2, %c0_3] : memref<1x32xf32, #tpu.memory_space<vmem>>, vector<1x32xf32>
    %c0_4 = arith.constant 0 : index
    %c0_5 = arith.constant 0 : index
    %3 = vector.load %arg4[%c0_4, %c0_5] : memref<1x32xf32, #tpu.memory_space<vmem>>, vector<1x32xf32>
    %cst = arith.constant dense<0.000000e+00> : vector<8xf32>
    %4 = vector.multi_reduction <add>, %1, %cst [1] : vector<8x32xf32> to vector<8xf32>
    %5 = vector.shape_cast %4 : vector<8xf32> to vector<8x1xf32>
    %cst_6 = arith.constant 3.200000e+01 : f32
    %6 = vector.broadcast %cst_6 : f32 to vector<8x1xf32>
    %7 = arith.divf %5, %6 : vector<8x1xf32>
    %8 = vector.broadcast %7 : vector<8x1xf32> to vector<8x32xf32>
    %9 = arith.subf %1, %8 : vector<8x32xf32>
    %10 = arith.mulf %9, %9 : vector<8x32xf32>
    %cst_7 = arith.constant dense<0.000000e+00> : vector<8xf32>
    %11 = vector.multi_reduction <add>, %10, %cst_7 [1] : vector<8x32xf32> to vector<8xf32>
    %12 = vector.shape_cast %11 : vector<8xf32> to vector<8x1xf32>
    %cst_8 = arith.constant 3.200000e+01 : f32
    %13 = vector.broadcast %cst_8 : f32 to vector<8x1xf32>
    %14 = arith.divf %12, %13 : vector<8x1xf32>
    %15 = vector.broadcast %7 : vector<8x1xf32> to vector<8x32xf32>
    %16 = arith.subf %1, %15 : vector<8x32xf32>
    %cst_9 = arith.constant 9.99999996E-13 : f32
    %17 = vector.broadcast %cst_9 : f32 to vector<8x1xf32>
    %18 = arith.addf %14, %17 : vector<8x1xf32>
    %19 = math.rsqrt %18 : vector<8x1xf32>
    %20 = vector.broadcast %19 : vector<8x1xf32> to vector<8x32xf32>
    %21 = arith.mulf %16, %20 : vector<8x32xf32>
    %22 = vector.broadcast %2 : vector<1x32xf32> to vector<8x32xf32>
    %23 = arith.mulf %21, %22 : vector<8x32xf32>
    %24 = vector.broadcast %3 : vector<1x32xf32> to vector<8x32xf32>
    %25 = arith.addf %23, %24 : vector<8x32xf32>
    %c0_10 = arith.constant 0 : index
    %c0_11 = arith.constant 0 : index
    %c0_12 = arith.constant 0 : index
    %26 = vector.load %arg2[%c0_10, %c0_11, %c0_12] : memref<1x1x8xf32, #tpu.memory_space<vmem>>, vector<1x1x8xf32>
    %27 = vector.shape_cast %26 : vector<1x1x8xf32> to vector<1x8xf32>
    %cst_13 = arith.constant 1.000000e+00 : f32
    %28 = vector.broadcast %cst_13 : f32 to vector<1x8xf32>
    %29 = arith.subf %28, %27 : vector<1x8xf32>
    %cst_14 = arith.constant -1.000000e+04 : f32
    %30 = vector.broadcast %cst_14 : f32 to vector<1x8xf32>
    %31 = arith.mulf %29, %30 : vector<1x8xf32>
    %c0_15 = arith.constant 0 : index
    %c0_16 = arith.constant 0 : index
    %c0_17 = arith.constant 0 : index
    %32 = vector.load %arg5[%c0_15, %c0_16, %c0_17] : memref<2x32x96xbf16, #tpu.memory_space<vmem>>, vector<1x32x96xbf16>
    %33 = vector.shape_cast %32 : vector<1x32x96xbf16> to vector<32x96xbf16>
    %34 = arith.truncf %25 : vector<8x32xf32> to vector<8x32xbf16>
    %cst_18 = arith.constant dense<0.000000e+00> : vector<8x96xf32>
    %35 = tpu.matmul %34, %33, %cst_18 {dimension_numbers = #tpu.dot_dimension_numbers<[1], [0], [0], [1], [0, 0, 1, 1], [], []>} : vector<8x32xbf16>, vector<32x96xbf16>, vector<8x96xf32> -> vector<8x96xf32>
    %c0_19 = arith.constant 0 : index
    %c0_20 = arith.constant 0 : index
    %c0_21 = arith.constant 0 : index
    %36 = vector.load %arg6[%c0_19, %c0_20, %c0_21] : memref<2x1x96xf32, #tpu.memory_space<vmem>>, vector<1x1x96xf32>
    %37 = vector.shape_cast %36 : vector<1x1x96xf32> to vector<1x96xf32>
    %38 = vector.broadcast %37 : vector<1x96xf32> to vector<8x96xf32>
    %39 = arith.addf %35, %38 : vector<8x96xf32>
    %40 = vector.extract_strided_slice %39 {offsets = [0, 0], sizes = [8, 8], strides = [1, 1]} : vector<8x96xf32> to vector<8x8xf32>
    %41 = vector.extract_strided_slice %39 {offsets = [0, 32], sizes = [8, 8], strides = [1, 1]} : vector<8x96xf32> to vector<8x8xf32>
    %42 = vector.extract_strided_slice %39 {offsets = [0, 64], sizes = [8, 8], strides = [1, 1]} : vector<8x96xf32> to vector<8x8xf32>
    %43 = arith.truncf %40 : vector<8x8xf32> to vector<8x8xbf16>
    %44 = arith.truncf %41 : vector<8x8xf32> to vector<8x8xbf16>
    %cst_22 = arith.constant dense<0.000000e+00> : vector<8x8xf32>
    %45 = tpu.matmul %43, %44, %cst_22 {dimension_numbers = #tpu.dot_dimension_numbers<[1], [1], [0], [0], [0, 0, 1, 0], [], []>} : vector<8x8xbf16>, vector<8x8xbf16>, vector<8x8xf32> -> vector<8x8xf32>
    %cst_23 = arith.constant 0.353553385 : f32
    %46 = vector.broadcast %cst_23 : f32 to vector<8x8xf32>
    %47 = arith.mulf %45, %46 : vector<8x8xf32>
    %48 = vector.broadcast %31 : vector<1x8xf32> to vector<8x8xf32>
    %49 = arith.addf %47, %48 : vector<8x8xf32>
    %cst_24 = arith.constant dense<0xFF800000> : vector<8xf32>
    %50 = vector.multi_reduction <maximumf>, %49, %cst_24 [1] : vector<8x8xf32> to vector<8xf32>
    %51 = vector.shape_cast %50 : vector<8xf32> to vector<8x1xf32>
    %52 = vector.broadcast %51 : vector<8x1xf32> to vector<8x8xf32>
    %53 = arith.subf %49, %52 : vector<8x8xf32>
    %54 = math.exp %53 : vector<8x8xf32>
    %cst_25 = arith.constant dense<0.000000e+00> : vector<8xf32>
    %55 = vector.multi_reduction <add>, %54, %cst_25 [1] : vector<8x8xf32> to vector<8xf32>
    %56 = vector.shape_cast %55 : vector<8xf32> to vector<8x1xf32>
    %57 = vector.broadcast %56 : vector<8x1xf32> to vector<8x8xf32>
    %58 = arith.divf %54, %57 : vector<8x8xf32>
    %59 = arith.truncf %58 : vector<8x8xf32> to vector<8x8xbf16>
    %60 = arith.truncf %42 : vector<8x8xf32> to vector<8x8xbf16>
    %cst_26 = arith.constant dense<0.000000e+00> : vector<8x8xf32>
    %61 = tpu.matmul %59, %60, %cst_26 {dimension_numbers = #tpu.dot_dimension_numbers<[1], [0], [0], [1], [0, 0, 1, 1], [], []>} : vector<8x8xbf16>, vector<8x8xbf16>, vector<8x8xf32> -> vector<8x8xf32>
    %62 = vector.extract_strided_slice %39 {offsets = [0, 8], sizes = [8, 8], strides = [1, 1]} : vector<8x96xf32> to vector<8x8xf32>
    %63 = vector.extract_strided_slice %39 {offsets = [0, 40], sizes = [8, 8], strides = [1, 1]} : vector<8x96xf32> to vector<8x8xf32>
    %64 = vector.extract_strided_slice %39 {offsets = [0, 72], sizes = [8, 8], strides = [1, 1]} : vector<8x96xf32> to vector<8x8xf32>
    %65 = arith.truncf %62 : vector<8x8xf32> to vector<8x8xbf16>
    %66 = arith.truncf %63 : vector<8x8xf32> to vector<8x8xbf16>
    %cst_27 = arith.constant dense<0.000000e+00> : vector<8x8xf32>
    %67 = tpu.matmul %65, %66, %cst_27 {dimension_numbers = #tpu.dot_dimension_numbers<[1], [1], [0], [0], [0, 0, 1, 0], [], []>} : vector<8x8xbf16>, vector<8x8xbf16>, vector<8x8xf32> -> vector<8x8xf32>
    %cst_28 = arith.constant 0.353553385 : f32
    %68 = vector.broadcast %cst_28 : f32 to vector<8x8xf32>
    %69 = arith.mulf %67, %68 : vector<8x8xf32>
    %70 = vector.broadcast %31 : vector<1x8xf32> to vector<8x8xf32>
    %71 = arith.addf %69, %70 : vector<8x8xf32>
    %cst_29 = arith.constant dense<0xFF800000> : vector<8xf32>
    %72 = vector.multi_reduction <maximumf>, %71, %cst_29 [1] : vector<8x8xf32> to vector<8xf32>
    %73 = vector.shape_cast %72 : vector<8xf32> to vector<8x1xf32>
    %74 = vector.broadcast %73 : vector<8x1xf32> to vector<8x8xf32>
    %75 = arith.subf %71, %74 : vector<8x8xf32>
    %76 = math.exp %75 : vector<8x8xf32>
    %cst_30 = arith.constant dense<0.000000e+00> : vector<8xf32>
    %77 = vector.multi_reduction <add>, %76, %cst_30 [1] : vector<8x8xf32> to vector<8xf32>
    %78 = vector.shape_cast %77 : vector<8xf32> to vector<8x1xf32>
    %79 = vector.broadcast %78 : vector<8x1xf32> to vector<8x8xf32>
    %80 = arith.divf %76, %79 : vector<8x8xf32>
    %81 = arith.truncf %80 : vector<8x8xf32> to vector<8x8xbf16>
    %82 = arith.truncf %64 : vector<8x8xf32> to vector<8x8xbf16>
    %cst_31 = arith.constant dense<0.000000e+00> : vector<8x8xf32>
    %83 = tpu.matmul %81, %82, %cst_31 {dimension_numbers = #tpu.dot_dimension_numbers<[1], [0], [0], [1], [0, 0, 1, 1], [], []>} : vector<8x8xbf16>, vector<8x8xbf16>, vector<8x8xf32> -> vector<8x8xf32>
    %84 = vector.extract_strided_slice %39 {offsets = [0, 16], sizes = [8, 8], strides = [1, 1]} : vector<8x96xf32> to vector<8x8xf32>
    %85 = vector.extract_strided_slice %39 {offsets = [0, 48], sizes = [8, 8], strides = [1, 1]} : vector<8x96xf32> to vector<8x8xf32>
    %86 = vector.extract_strided_slice %39 {offsets = [0, 80], sizes = [8, 8], strides = [1, 1]} : vector<8x96xf32> to vector<8x8xf32>
    %87 = arith.truncf %84 : vector<8x8xf32> to vector<8x8xbf16>
    %88 = arith.truncf %85 : vector<8x8xf32> to vector<8x8xbf16>
    %cst_32 = arith.constant dense<0.000000e+00> : vector<8x8xf32>
    %89 = tpu.matmul %87, %88, %cst_32 {dimension_numbers = #tpu.dot_dimension_numbers<[1], [1], [0], [0], [0, 0, 1, 0], [], []>} : vector<8x8xbf16>, vector<8x8xbf16>, vector<8x8xf32> -> vector<8x8xf32>
    %cst_33 = arith.constant 0.353553385 : f32
    %90 = vector.broadcast %cst_33 : f32 to vector<8x8xf32>
    %91 = arith.mulf %89, %90 : vector<8x8xf32>
    %92 = vector.broadcast %31 : vector<1x8xf32> to vector<8x8xf32>
    %93 = arith.addf %91, %92 : vector<8x8xf32>
    %cst_34 = arith.constant dense<0xFF800000> : vector<8xf32>
    %94 = vector.multi_reduction <maximumf>, %93, %cst_34 [1] : vector<8x8xf32> to vector<8xf32>
    %95 = vector.shape_cast %94 : vector<8xf32> to vector<8x1xf32>
    %96 = vector.broadcast %95 : vector<8x1xf32> to vector<8x8xf32>
    %97 = arith.subf %93, %96 : vector<8x8xf32>
    %98 = math.exp %97 : vector<8x8xf32>
    %cst_35 = arith.constant dense<0.000000e+00> : vector<8xf32>
    %99 = vector.multi_reduction <add>, %98, %cst_35 [1] : vector<8x8xf32> to vector<8xf32>
    %100 = vector.shape_cast %99 : vector<8xf32> to vector<8x1xf32>
    %101 = vector.broadcast %100 : vector<8x1xf32> to vector<8x8xf32>
    %102 = arith.divf %98, %101 : vector<8x8xf32>
    %103 = arith.truncf %102 : vector<8x8xf32> to vector<8x8xbf16>
    %104 = arith.truncf %86 : vector<8x8xf32> to vector<8x8xbf16>
    %cst_36 = arith.constant dense<0.000000e+00> : vector<8x8xf32>
    %105 = tpu.matmul %103, %104, %cst_36 {dimension_numbers = #tpu.dot_dimension_numbers<[1], [0], [0], [1], [0, 0, 1, 1], [], []>} : vector<8x8xbf16>, vector<8x8xbf16>, vector<8x8xf32> -> vector<8x8xf32>
    %106 = vector.extract_strided_slice %39 {offsets = [0, 24], sizes = [8, 8], strides = [1, 1]} : vector<8x96xf32> to vector<8x8xf32>
    %107 = vector.extract_strided_slice %39 {offsets = [0, 56], sizes = [8, 8], strides = [1, 1]} : vector<8x96xf32> to vector<8x8xf32>
    %108 = vector.extract_strided_slice %39 {offsets = [0, 88], sizes = [8, 8], strides = [1, 1]} : vector<8x96xf32> to vector<8x8xf32>
    %109 = arith.truncf %106 : vector<8x8xf32> to vector<8x8xbf16>
    %110 = arith.truncf %107 : vector<8x8xf32> to vector<8x8xbf16>
    %cst_37 = arith.constant dense<0.000000e+00> : vector<8x8xf32>
    %111 = tpu.matmul %109, %110, %cst_37 {dimension_numbers = #tpu.dot_dimension_numbers<[1], [1], [0], [0], [0, 0, 1, 0], [], []>} : vector<8x8xbf16>, vector<8x8xbf16>, vector<8x8xf32> -> vector<8x8xf32>
    %cst_38 = arith.constant 0.353553385 : f32
    %112 = vector.broadcast %cst_38 : f32 to vector<8x8xf32>
    %113 = arith.mulf %111, %112 : vector<8x8xf32>
    %114 = vector.broadcast %31 : vector<1x8xf32> to vector<8x8xf32>
    %115 = arith.addf %113, %114 : vector<8x8xf32>
    %cst_39 = arith.constant dense<0xFF800000> : vector<8xf32>
    %116 = vector.multi_reduction <maximumf>, %115, %cst_39 [1] : vector<8x8xf32> to vector<8xf32>
    %117 = vector.shape_cast %116 : vector<8xf32> to vector<8x1xf32>
    %118 = vector.broadcast %117 : vector<8x1xf32> to vector<8x8xf32>
    %119 = arith.subf %115, %118 : vector<8x8xf32>
    %120 = math.exp %119 : vector<8x8xf32>
    %cst_40 = arith.constant dense<0.000000e+00> : vector<8xf32>
    %121 = vector.multi_reduction <add>, %120, %cst_40 [1] : vector<8x8xf32> to vector<8xf32>
    %122 = vector.shape_cast %121 : vector<8xf32> to vector<8x1xf32>
    %123 = vector.broadcast %122 : vector<8x1xf32> to vector<8x8xf32>
    %124 = arith.divf %120, %123 : vector<8x8xf32>
    %125 = arith.truncf %124 : vector<8x8xf32> to vector<8x8xbf16>
    %126 = arith.truncf %108 : vector<8x8xf32> to vector<8x8xbf16>
    %cst_41 = arith.constant dense<0.000000e+00> : vector<8x8xf32>
    %127 = tpu.matmul %125, %126, %cst_41 {dimension_numbers = #tpu.dot_dimension_numbers<[1], [0], [0], [1], [0, 0, 1, 1], [], []>} : vector<8x8xbf16>, vector<8x8xbf16>, vector<8x8xf32> -> vector<8x8xf32>
    %128 = tpu.concatenate %61, %83, %105, %127 in 1 : vector<8x8xf32>, vector<8x8xf32>, vector<8x8xf32>, vector<8x8xf32> -> vector<8x32xf32>
    %c0_42 = arith.constant 0 : index
    %c0_43 = arith.constant 0 : index
    %c0_44 = arith.constant 0 : index
    %129 = vector.load %arg7[%c0_42, %c0_43, %c0_44] : memref<2x32x32xbf16, #tpu.memory_space<vmem>>, vector<1x32x32xbf16>
    %130 = vector.shape_cast %129 : vector<1x32x32xbf16> to vector<32x32xbf16>
    %131 = arith.truncf %128 : vector<8x32xf32> to vector<8x32xbf16>
    %cst_45 = arith.constant dense<0.000000e+00> : vector<8x32xf32>
    %132 = tpu.matmul %131, %130, %cst_45 {dimension_numbers = #tpu.dot_dimension_numbers<[1], [0], [0], [1], [0, 0, 1, 1], [], []>} : vector<8x32xbf16>, vector<32x32xbf16>, vector<8x32xf32> -> vector<8x32xf32>
    %c0_46 = arith.constant 0 : index
    %c0_47 = arith.constant 0 : index
    %c0_48 = arith.constant 0 : index
    %133 = vector.load %arg8[%c0_46, %c0_47, %c0_48] : memref<2x1x32xf32, #tpu.memory_space<vmem>>, vector<1x1x32xf32>
    %134 = vector.shape_cast %133 : vector<1x1x32xf32> to vector<1x32xf32>
    %135 = vector.broadcast %134 : vector<1x32xf32> to vector<8x32xf32>
    %136 = arith.addf %132, %135 : vector<8x32xf32>
    %137 = arith.addf %25, %136 : vector<8x32xf32>
    %c0_49 = arith.constant 0 : index
    %c0_50 = arith.constant 0 : index
    %c0_51 = arith.constant 0 : index
    %138 = vector.load %arg9[%c0_49, %c0_50, %c0_51] : memref<2x1x32xf32, #tpu.memory_space<vmem>>, vector<1x1x32xf32>
    %139 = vector.shape_cast %138 : vector<1x1x32xf32> to vector<1x32xf32>
    %c0_52 = arith.constant 0 : index
    %c0_53 = arith.constant 0 : index
    %c0_54 = arith.constant 0 : index
    %140 = vector.load %arg10[%c0_52, %c0_53, %c0_54] : memref<2x1x32xf32, #tpu.memory_space<vmem>>, vector<1x1x32xf32>
    %141 = vector.shape_cast %140 : vector<1x1x32xf32> to vector<1x32xf32>
    %cst_55 = arith.constant dense<0.000000e+00> : vector<8xf32>
    %142 = vector.multi_reduction <add>, %137, %cst_55 [1] : vector<8x32xf32> to vector<8xf32>
    %143 = vector.shape_cast %142 : vector<8xf32> to vector<8x1xf32>
    %cst_56 = arith.constant 3.200000e+01 : f32
    %144 = vector.broadcast %cst_56 : f32 to vector<8x1xf32>
    %145 = arith.divf %143, %144 : vector<8x1xf32>
    %146 = vector.broadcast %145 : vector<8x1xf32> to vector<8x32xf32>
    %147 = arith.subf %137, %146 : vector<8x32xf32>
    %148 = arith.mulf %147, %147 : vector<8x32xf32>
    %cst_57 = arith.constant dense<0.000000e+00> : vector<8xf32>
    %149 = vector.multi_reduction <add>, %148, %cst_57 [1] : vector<8x32xf32> to vector<8xf32>
    %150 = vector.shape_cast %149 : vector<8xf32> to vector<8x1xf32>
    %cst_58 = arith.constant 3.200000e+01 : f32
    %151 = vector.broadcast %cst_58 : f32 to vector<8x1xf32>
    %152 = arith.divf %150, %151 : vector<8x1xf32>
    %153 = vector.broadcast %145 : vector<8x1xf32> to vector<8x32xf32>
    %154 = arith.subf %137, %153 : vector<8x32xf32>
    %cst_59 = arith.constant 9.99999996E-13 : f32
    %155 = vector.broadcast %cst_59 : f32 to vector<8x1xf32>
    %156 = arith.addf %152, %155 : vector<8x1xf32>
    %157 = math.rsqrt %156 : vector<8x1xf32>
    %158 = vector.broadcast %157 : vector<8x1xf32> to vector<8x32xf32>
    %159 = arith.mulf %154, %158 : vector<8x32xf32>
    %160 = vector.broadcast %139 : vector<1x32xf32> to vector<8x32xf32>
    %161 = arith.mulf %159, %160 : vector<8x32xf32>
    %162 = vector.broadcast %141 : vector<1x32xf32> to vector<8x32xf32>
    %163 = arith.addf %161, %162 : vector<8x32xf32>
    %c0_60 = arith.constant 0 : index
    %c0_61 = arith.constant 0 : index
    %c0_62 = arith.constant 0 : index
    %164 = vector.load %arg11[%c0_60, %c0_61, %c0_62] : memref<2x32x64xbf16, #tpu.memory_space<vmem>>, vector<1x32x64xbf16>
    %165 = vector.shape_cast %164 : vector<1x32x64xbf16> to vector<32x64xbf16>
    %166 = arith.truncf %163 : vector<8x32xf32> to vector<8x32xbf16>
    %cst_63 = arith.constant dense<0.000000e+00> : vector<8x64xf32>
    %167 = tpu.matmul %166, %165, %cst_63 {dimension_numbers = #tpu.dot_dimension_numbers<[1], [0], [0], [1], [0, 0, 1, 1], [], []>} : vector<8x32xbf16>, vector<32x64xbf16>, vector<8x64xf32> -> vector<8x64xf32>
    %c0_64 = arith.constant 0 : index
    %c0_65 = arith.constant 0 : index
    %c0_66 = arith.constant 0 : index
    %168 = vector.load %arg12[%c0_64, %c0_65, %c0_66] : memref<2x1x64xf32, #tpu.memory_space<vmem>>, vector<1x1x64xf32>
    %169 = vector.shape_cast %168 : vector<1x1x64xf32> to vector<1x64xf32>
    %170 = vector.broadcast %169 : vector<1x64xf32> to vector<8x64xf32>
    %171 = arith.addf %167, %170 : vector<8x64xf32>
    %cst_67 = arith.constant 5.000000e-01 : f32
    %172 = vector.broadcast %cst_67 : f32 to vector<8x64xf32>
    %173 = arith.mulf %172, %171 : vector<8x64xf32>
    %cst_68 = arith.constant 4.471500e-02 : f32
    %174 = vector.broadcast %cst_68 : f32 to vector<8x64xf32>
    %175 = arith.mulf %174, %171 : vector<8x64xf32>
    %176 = arith.mulf %175, %171 : vector<8x64xf32>
    %177 = arith.mulf %176, %171 : vector<8x64xf32>
    %178 = arith.addf %171, %177 : vector<8x64xf32>
    %cst_69 = arith.constant 0.797884583 : f32
    %179 = vector.broadcast %cst_69 : f32 to vector<8x64xf32>
    %180 = arith.mulf %179, %178 : vector<8x64xf32>
    %181 = math.tanh %180 : vector<8x64xf32>
    %cst_70 = arith.constant 1.000000e+00 : f32
    %182 = vector.broadcast %cst_70 : f32 to vector<8x64xf32>
    %183 = arith.addf %182, %181 : vector<8x64xf32>
    %184 = arith.mulf %173, %183 : vector<8x64xf32>
    %c0_71 = arith.constant 0 : index
    %c0_72 = arith.constant 0 : index
    %c0_73 = arith.constant 0 : index
    %185 = vector.load %arg13[%c0_71, %c0_72, %c0_73] : memref<2x64x32xbf16, #tpu.memory_space<vmem>>, vector<1x64x32xbf16>
    %186 = vector.shape_cast %185 : vector<1x64x32xbf16> to vector<64x32xbf16>
    %187 = arith.truncf %184 : vector<8x64xf32> to vector<8x64xbf16>
    %cst_74 = arith.constant dense<0.000000e+00> : vector<8x32xf32>
    %188 = tpu.matmul %187, %186, %cst_74 {dimension_numbers = #tpu.dot_dimension_numbers<[1], [0], [0], [1], [0, 0, 1, 1], [], []>} : vector<8x64xbf16>, vector<64x32xbf16>, vector<8x32xf32> -> vector<8x32xf32>
    %c0_75 = arith.constant 0 : index
    %c0_76 = arith.constant 0 : index
    %c0_77 = arith.constant 0 : index
    %189 = vector.load %arg14[%c0_75, %c0_76, %c0_77] : memref<2x1x32xf32, #tpu.memory_space<vmem>>, vector<1x1x32xf32>
    %190 = vector.shape_cast %189 : vector<1x1x32xf32> to vector<1x32xf32>
    %191 = vector.broadcast %190 : vector<1x32xf32> to vector<8x32xf32>
    %192 = arith.addf %188, %191 : vector<8x32xf32>
    %193 = arith.addf %163, %192 : vector<8x32xf32>
    %c0_78 = arith.constant 0 : index
    %c0_79 = arith.constant 0 : index
    %c0_80 = arith.constant 0 : index
    %194 = vector.load %arg15[%c0_78, %c0_79, %c0_80] : memref<2x1x32xf32, #tpu.memory_space<vmem>>, vector<1x1x32xf32>
    %195 = vector.shape_cast %194 : vector<1x1x32xf32> to vector<1x32xf32>
    %c0_81 = arith.constant 0 : index
    %c0_82 = arith.constant 0 : index
    %c0_83 = arith.constant 0 : index
    %196 = vector.load %arg16[%c0_81, %c0_82, %c0_83] : memref<2x1x32xf32, #tpu.memory_space<vmem>>, vector<1x1x32xf32>
    %197 = vector.shape_cast %196 : vector<1x1x32xf32> to vector<1x32xf32>
    %cst_84 = arith.constant dense<0.000000e+00> : vector<8xf32>
    %198 = vector.multi_reduction <add>, %193, %cst_84 [1] : vector<8x32xf32> to vector<8xf32>
    %199 = vector.shape_cast %198 : vector<8xf32> to vector<8x1xf32>
    %cst_85 = arith.constant 3.200000e+01 : f32
    %200 = vector.broadcast %cst_85 : f32 to vector<8x1xf32>
    %201 = arith.divf %199, %200 : vector<8x1xf32>
    %202 = vector.broadcast %201 : vector<8x1xf32> to vector<8x32xf32>
    %203 = arith.subf %193, %202 : vector<8x32xf32>
    %204 = arith.mulf %203, %203 : vector<8x32xf32>
    %cst_86 = arith.constant dense<0.000000e+00> : vector<8xf32>
    %205 = vector.multi_reduction <add>, %204, %cst_86 [1] : vector<8x32xf32> to vector<8xf32>
    %206 = vector.shape_cast %205 : vector<8xf32> to vector<8x1xf32>
    %cst_87 = arith.constant 3.200000e+01 : f32
    %207 = vector.broadcast %cst_87 : f32 to vector<8x1xf32>
    %208 = arith.divf %206, %207 : vector<8x1xf32>
    %209 = vector.broadcast %201 : vector<8x1xf32> to vector<8x32xf32>
    %210 = arith.subf %193, %209 : vector<8x32xf32>
    %cst_88 = arith.constant 9.99999996E-13 : f32
    %211 = vector.broadcast %cst_88 : f32 to vector<8x1xf32>
    %212 = arith.addf %208, %211 : vector<8x1xf32>
    %213 = math.rsqrt %212 : vector<8x1xf32>
    %214 = vector.broadcast %213 : vector<8x1xf32> to vector<8x32xf32>
    %215 = arith.mulf %210, %214 : vector<8x32xf32>
    %216 = vector.broadcast %195 : vector<1x32xf32> to vector<8x32xf32>
    %217 = arith.mulf %215, %216 : vector<8x32xf32>
    %218 = vector.broadcast %197 : vector<1x32xf32> to vector<8x32xf32>
    %219 = arith.addf %217, %218 : vector<8x32xf32>
    %c1 = arith.constant 1 : index
    %c0_89 = arith.constant 0 : index
    %c0_90 = arith.constant 0 : index
    %220 = vector.load %arg5[%c1, %c0_89, %c0_90] : memref<2x32x96xbf16, #tpu.memory_space<vmem>>, vector<1x32x96xbf16>
    %221 = vector.shape_cast %220 : vector<1x32x96xbf16> to vector<32x96xbf16>
    %222 = arith.truncf %219 : vector<8x32xf32> to vector<8x32xbf16>
    %cst_91 = arith.constant dense<0.000000e+00> : vector<8x96xf32>
    %223 = tpu.matmul %222, %221, %cst_91 {dimension_numbers = #tpu.dot_dimension_numbers<[1], [0], [0], [1], [0, 0, 1, 1], [], []>} : vector<8x32xbf16>, vector<32x96xbf16>, vector<8x96xf32> -> vector<8x96xf32>
    %c1_92 = arith.constant 1 : index
    %c0_93 = arith.constant 0 : index
    %c0_94 = arith.constant 0 : index
    %224 = vector.load %arg6[%c1_92, %c0_93, %c0_94] : memref<2x1x96xf32, #tpu.memory_space<vmem>>, vector<1x1x96xf32>
    %225 = vector.shape_cast %224 : vector<1x1x96xf32> to vector<1x96xf32>
    %226 = vector.broadcast %225 : vector<1x96xf32> to vector<8x96xf32>
    %227 = arith.addf %223, %226 : vector<8x96xf32>
    %228 = vector.extract_strided_slice %227 {offsets = [0, 0], sizes = [8, 8], strides = [1, 1]} : vector<8x96xf32> to vector<8x8xf32>
    %229 = vector.extract_strided_slice %227 {offsets = [0, 32], sizes = [8, 8], strides = [1, 1]} : vector<8x96xf32> to vector<8x8xf32>
    %230 = vector.extract_strided_slice %227 {offsets = [0, 64], sizes = [8, 8], strides = [1, 1]} : vector<8x96xf32> to vector<8x8xf32>
    %231 = arith.truncf %228 : vector<8x8xf32> to vector<8x8xbf16>
    %232 = arith.truncf %229 : vector<8x8xf32> to vector<8x8xbf16>
    %cst_95 = arith.constant dense<0.000000e+00> : vector<8x8xf32>
    %233 = tpu.matmul %231, %232, %cst_95 {dimension_numbers = #tpu.dot_dimension_numbers<[1], [1], [0], [0], [0, 0, 1, 0], [], []>} : vector<8x8xbf16>, vector<8x8xbf16>, vector<8x8xf32> -> vector<8x8xf32>
    %cst_96 = arith.constant 0.353553385 : f32
    %234 = vector.broadcast %cst_96 : f32 to vector<8x8xf32>
    %235 = arith.mulf %233, %234 : vector<8x8xf32>
    %236 = vector.broadcast %31 : vector<1x8xf32> to vector<8x8xf32>
    %237 = arith.addf %235, %236 : vector<8x8xf32>
    %cst_97 = arith.constant dense<0xFF800000> : vector<8xf32>
    %238 = vector.multi_reduction <maximumf>, %237, %cst_97 [1] : vector<8x8xf32> to vector<8xf32>
    %239 = vector.shape_cast %238 : vector<8xf32> to vector<8x1xf32>
    %240 = vector.broadcast %239 : vector<8x1xf32> to vector<8x8xf32>
    %241 = arith.subf %237, %240 : vector<8x8xf32>
    %242 = math.exp %241 : vector<8x8xf32>
    %cst_98 = arith.constant dense<0.000000e+00> : vector<8xf32>
    %243 = vector.multi_reduction <add>, %242, %cst_98 [1] : vector<8x8xf32> to vector<8xf32>
    %244 = vector.shape_cast %243 : vector<8xf32> to vector<8x1xf32>
    %245 = vector.broadcast %244 : vector<8x1xf32> to vector<8x8xf32>
    %246 = arith.divf %242, %245 : vector<8x8xf32>
    %247 = arith.truncf %246 : vector<8x8xf32> to vector<8x8xbf16>
    %248 = arith.truncf %230 : vector<8x8xf32> to vector<8x8xbf16>
    %cst_99 = arith.constant dense<0.000000e+00> : vector<8x8xf32>
    %249 = tpu.matmul %247, %248, %cst_99 {dimension_numbers = #tpu.dot_dimension_numbers<[1], [0], [0], [1], [0, 0, 1, 1], [], []>} : vector<8x8xbf16>, vector<8x8xbf16>, vector<8x8xf32> -> vector<8x8xf32>
    %250 = vector.extract_strided_slice %227 {offsets = [0, 8], sizes = [8, 8], strides = [1, 1]} : vector<8x96xf32> to vector<8x8xf32>
    %251 = vector.extract_strided_slice %227 {offsets = [0, 40], sizes = [8, 8], strides = [1, 1]} : vector<8x96xf32> to vector<8x8xf32>
    %252 = vector.extract_strided_slice %227 {offsets = [0, 72], sizes = [8, 8], strides = [1, 1]} : vector<8x96xf32> to vector<8x8xf32>
    %253 = arith.truncf %250 : vector<8x8xf32> to vector<8x8xbf16>
    %254 = arith.truncf %251 : vector<8x8xf32> to vector<8x8xbf16>
    %cst_100 = arith.constant dense<0.000000e+00> : vector<8x8xf32>
    %255 = tpu.matmul %253, %254, %cst_100 {dimension_numbers = #tpu.dot_dimension_numbers<[1], [1], [0], [0], [0, 0, 1, 0], [], []>} : vector<8x8xbf16>, vector<8x8xbf16>, vector<8x8xf32> -> vector<8x8xf32>
    %cst_101 = arith.constant 0.353553385 : f32
    %256 = vector.broadcast %cst_101 : f32 to vector<8x8xf32>
    %257 = arith.mulf %255, %256 : vector<8x8xf32>
    %258 = vector.broadcast %31 : vector<1x8xf32> to vector<8x8xf32>
    %259 = arith.addf %257, %258 : vector<8x8xf32>
    %cst_102 = arith.constant dense<0xFF800000> : vector<8xf32>
    %260 = vector.multi_reduction <maximumf>, %259, %cst_102 [1] : vector<8x8xf32> to vector<8xf32>
    %261 = vector.shape_cast %260 : vector<8xf32> to vector<8x1xf32>
    %262 = vector.broadcast %261 : vector<8x1xf32> to vector<8x8xf32>
    %263 = arith.subf %259, %262 : vector<8x8xf32>
    %264 = math.exp %263 : vector<8x8xf32>
    %cst_103 = arith.constant dense<0.000000e+00> : vector<8xf32>
    %265 = vector.multi_reduction <add>, %264, %cst_103 [1] : vector<8x8xf32> to vector<8xf32>
    %266 = vector.shape_cast %265 : vector<8xf32> to vector<8x1xf32>
    %267 = vector.broadcast %266 : vector<8x1xf32> to vector<8x8xf32>
    %268 = arith.divf %264, %267 : vector<8x8xf32>
    %269 = arith.truncf %268 : vector<8x8xf32> to vector<8x8xbf16>
    %270 = arith.truncf %252 : vector<8x8xf32> to vector<8x8xbf16>
    %cst_104 = arith.constant dense<0.000000e+00> : vector<8x8xf32>
    %271 = tpu.matmul %269, %270, %cst_104 {dimension_numbers = #tpu.dot_dimension_numbers<[1], [0], [0], [1], [0, 0, 1, 1], [], []>} : vector<8x8xbf16>, vector<8x8xbf16>, vector<8x8xf32> -> vector<8x8xf32>
    %272 = vector.extract_strided_slice %227 {offsets = [0, 16], sizes = [8, 8], strides = [1, 1]} : vector<8x96xf32> to vector<8x8xf32>
    %273 = vector.extract_strided_slice %227 {offsets = [0, 48], sizes = [8, 8], strides = [1, 1]} : vector<8x96xf32> to vector<8x8xf32>
    %274 = vector.extract_strided_slice %227 {offsets = [0, 80], sizes = [8, 8], strides = [1, 1]} : vector<8x96xf32> to vector<8x8xf32>
    %275 = arith.truncf %272 : vector<8x8xf32> to vector<8x8xbf16>
    %276 = arith.truncf %273 : vector<8x8xf32> to vector<8x8xbf16>
    %cst_105 = arith.constant dense<0.000000e+00> : vector<8x8xf32>
    %277 = tpu.matmul %275, %276, %cst_105 {dimension_numbers = #tpu.dot_dimension_numbers<[1], [1], [0], [0], [0, 0, 1, 0], [], []>} : vector<8x8xbf16>, vector<8x8xbf16>, vector<8x8xf32> -> vector<8x8xf32>
    %cst_106 = arith.constant 0.353553385 : f32
    %278 = vector.broadcast %cst_106 : f32 to vector<8x8xf32>
    %279 = arith.mulf %277, %278 : vector<8x8xf32>
    %280 = vector.broadcast %31 : vector<1x8xf32> to vector<8x8xf32>
    %281 = arith.addf %279, %280 : vector<8x8xf32>
    %cst_107 = arith.constant dense<0xFF800000> : vector<8xf32>
    %282 = vector.multi_reduction <maximumf>, %281, %cst_107 [1] : vector<8x8xf32> to vector<8xf32>
    %283 = vector.shape_cast %282 : vector<8xf32> to vector<8x1xf32>
    %284 = vector.broadcast %283 : vector<8x1xf32> to vector<8x8xf32>
    %285 = arith.subf %281, %284 : vector<8x8xf32>
    %286 = math.exp %285 : vector<8x8xf32>
    %cst_108 = arith.constant dense<0.000000e+00> : vector<8xf32>
    %287 = vector.multi_reduction <add>, %286, %cst_108 [1] : vector<8x8xf32> to vector<8xf32>
    %288 = vector.shape_cast %287 : vector<8xf32> to vector<8x1xf32>
    %289 = vector.broadcast %288 : vector<8x1xf32> to vector<8x8xf32>
    %290 = arith.divf %286, %289 : vector<8x8xf32>
    %291 = arith.truncf %290 : vector<8x8xf32> to vector<8x8xbf16>
    %292 = arith.truncf %274 : vector<8x8xf32> to vector<8x8xbf16>
    %cst_109 = arith.constant dense<0.000000e+00> : vector<8x8xf32>
    %293 = tpu.matmul %291, %292, %cst_109 {dimension_numbers = #tpu.dot_dimension_numbers<[1], [0], [0], [1], [0, 0, 1, 1], [], []>} : vector<8x8xbf16>, vector<8x8xbf16>, vector<8x8xf32> -> vector<8x8xf32>
    %294 = vector.extract_strided_slice %227 {offsets = [0, 24], sizes = [8, 8], strides = [1, 1]} : vector<8x96xf32> to vector<8x8xf32>
    %295 = vector.extract_strided_slice %227 {offsets = [0, 56], sizes = [8, 8], strides = [1, 1]} : vector<8x96xf32> to vector<8x8xf32>
    %296 = vector.extract_strided_slice %227 {offsets = [0, 88], sizes = [8, 8], strides = [1, 1]} : vector<8x96xf32> to vector<8x8xf32>
    %297 = arith.truncf %294 : vector<8x8xf32> to vector<8x8xbf16>
    %298 = arith.truncf %295 : vector<8x8xf32> to vector<8x8xbf16>
    %cst_110 = arith.constant dense<0.000000e+00> : vector<8x8xf32>
    %299 = tpu.matmul %297, %298, %cst_110 {dimension_numbers = #tpu.dot_dimension_numbers<[1], [1], [0], [0], [0, 0, 1, 0], [], []>} : vector<8x8xbf16>, vector<8x8xbf16>, vector<8x8xf32> -> vector<8x8xf32>
    %cst_111 = arith.constant 0.353553385 : f32
    %300 = vector.broadcast %cst_111 : f32 to vector<8x8xf32>
    %301 = arith.mulf %299, %300 : vector<8x8xf32>
    %302 = vector.broadcast %31 : vector<1x8xf32> to vector<8x8xf32>
    %303 = arith.addf %301, %302 : vector<8x8xf32>
    %cst_112 = arith.constant dense<0xFF800000> : vector<8xf32>
    %304 = vector.multi_reduction <maximumf>, %303, %cst_112 [1] : vector<8x8xf32> to vector<8xf32>
    %305 = vector.shape_cast %304 : vector<8xf32> to vector<8x1xf32>
    %306 = vector.broadcast %305 : vector<8x1xf32> to vector<8x8xf32>
    %307 = arith.subf %303, %306 : vector<8x8xf32>
    %308 = math.exp %307 : vector<8x8xf32>
    %cst_113 = arith.constant dense<0.000000e+00> : vector<8xf32>
    %309 = vector.multi_reduction <add>, %308, %cst_113 [1] : vector<8x8xf32> to vector<8xf32>
    %310 = vector.shape_cast %309 : vector<8xf32> to vector<8x1xf32>
    %311 = vector.broadcast %310 : vector<8x1xf32> to vector<8x8xf32>
    %312 = arith.divf %308, %311 : vector<8x8xf32>
    %313 = arith.truncf %312 : vector<8x8xf32> to vector<8x8xbf16>
    %314 = arith.truncf %296 : vector<8x8xf32> to vector<8x8xbf16>
    %cst_114 = arith.constant dense<0.000000e+00> : vector<8x8xf32>
    %315 = tpu.matmul %313, %314, %cst_114 {dimension_numbers = #tpu.dot_dimension_numbers<[1], [0], [0], [1], [0, 0, 1, 1], [], []>} : vector<8x8xbf16>, vector<8x8xbf16>, vector<8x8xf32> -> vector<8x8xf32>
    %316 = tpu.concatenate %249, %271, %293, %315 in 1 : vector<8x8xf32>, vector<8x8xf32>, vector<8x8xf32>, vector<8x8xf32> -> vector<8x32xf32>
    %c1_115 = arith.constant 1 : index
    %c0_116 = arith.constant 0 : index
    %c0_117 = arith.constant 0 : index
    %317 = vector.load %arg7[%c1_115, %c0_116, %c0_117] : memref<2x32x32xbf16, #tpu.memory_space<vmem>>, vector<1x32x32xbf16>
    %318 = vector.shape_cast %317 : vector<1x32x32xbf16> to vector<32x32xbf16>
    %319 = arith.truncf %316 : vector<8x32xf32> to vector<8x32xbf16>
    %cst_118 = arith.constant dense<0.000000e+00> : vector<8x32xf32>
    %320 = tpu.matmul %319, %318, %cst_118 {dimension_numbers = #tpu.dot_dimension_numbers<[1], [0], [0], [1], [0, 0, 1, 1], [], []>} : vector<8x32xbf16>, vector<32x32xbf16>, vector<8x32xf32> -> vector<8x32xf32>
    %c1_119 = arith.constant 1 : index
    %c0_120 = arith.constant 0 : index
    %c0_121 = arith.constant 0 : index
    %321 = vector.load %arg8[%c1_119, %c0_120, %c0_121] : memref<2x1x32xf32, #tpu.memory_space<vmem>>, vector<1x1x32xf32>
    %322 = vector.shape_cast %321 : vector<1x1x32xf32> to vector<1x32xf32>
    %323 = vector.broadcast %322 : vector<1x32xf32> to vector<8x32xf32>
    %324 = arith.addf %320, %323 : vector<8x32xf32>
    %325 = arith.addf %219, %324 : vector<8x32xf32>
    %c1_122 = arith.constant 1 : index
    %c0_123 = arith.constant 0 : index
    %c0_124 = arith.constant 0 : index
    %326 = vector.load %arg9[%c1_122, %c0_123, %c0_124] : memref<2x1x32xf32, #tpu.memory_space<vmem>>, vector<1x1x32xf32>
    %327 = vector.shape_cast %326 : vector<1x1x32xf32> to vector<1x32xf32>
    %c1_125 = arith.constant 1 : index
    %c0_126 = arith.constant 0 : index
    %c0_127 = arith.constant 0 : index
    %328 = vector.load %arg10[%c1_125, %c0_126, %c0_127] : memref<2x1x32xf32, #tpu.memory_space<vmem>>, vector<1x1x32xf32>
    %329 = vector.shape_cast %328 : vector<1x1x32xf32> to vector<1x32xf32>
    %cst_128 = arith.constant dense<0.000000e+00> : vector<8xf32>
    %330 = vector.multi_reduction <add>, %325, %cst_128 [1] : vector<8x32xf32> to vector<8xf32>
    %331 = vector.shape_cast %330 : vector<8xf32> to vector<8x1xf32>
    %cst_129 = arith.constant 3.200000e+01 : f32
    %332 = vector.broadcast %cst_129 : f32 to vector<8x1xf32>
    %333 = arith.divf %331, %332 : vector<8x1xf32>
    %334 = vector.broadcast %333 : vector<8x1xf32> to vector<8x32xf32>
    %335 = arith.subf %325, %334 : vector<8x32xf32>
    %336 = arith.mulf %335, %335 : vector<8x32xf32>
    %cst_130 = arith.constant dense<0.000000e+00> : vector<8xf32>
    %337 = vector.multi_reduction <add>, %336, %cst_130 [1] : vector<8x32xf32> to vector<8xf32>
    %338 = vector.shape_cast %337 : vector<8xf32> to vector<8x1xf32>
    %cst_131 = arith.constant 3.200000e+01 : f32
    %339 = vector.broadcast %cst_131 : f32 to vector<8x1xf32>
    %340 = arith.divf %338, %339 : vector<8x1xf32>
    %341 = vector.broadcast %333 : vector<8x1xf32> to vector<8x32xf32>
    %342 = arith.subf %325, %341 : vector<8x32xf32>
    %cst_132 = arith.constant 9.99999996E-13 : f32
    %343 = vector.broadcast %cst_132 : f32 to vector<8x1xf32>
    %344 = arith.addf %340, %343 : vector<8x1xf32>
    %345 = math.rsqrt %344 : vector<8x1xf32>
    %346 = vector.broadcast %345 : vector<8x1xf32> to vector<8x32xf32>
    %347 = arith.mulf %342, %346 : vector<8x32xf32>
    %348 = vector.broadcast %327 : vector<1x32xf32> to vector<8x32xf32>
    %349 = arith.mulf %347, %348 : vector<8x32xf32>
    %350 = vector.broadcast %329 : vector<1x32xf32> to vector<8x32xf32>
    %351 = arith.addf %349, %350 : vector<8x32xf32>
    %c1_133 = arith.constant 1 : index
    %c0_134 = arith.constant 0 : index
    %c0_135 = arith.constant 0 : index
    %352 = vector.load %arg11[%c1_133, %c0_134, %c0_135] : memref<2x32x64xbf16, #tpu.memory_space<vmem>>, vector<1x32x64xbf16>
    %353 = vector.shape_cast %352 : vector<1x32x64xbf16> to vector<32x64xbf16>
    %354 = arith.truncf %351 : vector<8x32xf32> to vector<8x32xbf16>
    %cst_136 = arith.constant dense<0.000000e+00> : vector<8x64xf32>
    %355 = tpu.matmul %354, %353, %cst_136 {dimension_numbers = #tpu.dot_dimension_numbers<[1], [0], [0], [1], [0, 0, 1, 1], [], []>} : vector<8x32xbf16>, vector<32x64xbf16>, vector<8x64xf32> -> vector<8x64xf32>
    %c1_137 = arith.constant 1 : index
    %c0_138 = arith.constant 0 : index
    %c0_139 = arith.constant 0 : index
    %356 = vector.load %arg12[%c1_137, %c0_138, %c0_139] : memref<2x1x64xf32, #tpu.memory_space<vmem>>, vector<1x1x64xf32>
    %357 = vector.shape_cast %356 : vector<1x1x64xf32> to vector<1x64xf32>
    %358 = vector.broadcast %357 : vector<1x64xf32> to vector<8x64xf32>
    %359 = arith.addf %355, %358 : vector<8x64xf32>
    %cst_140 = arith.constant 5.000000e-01 : f32
    %360 = vector.broadcast %cst_140 : f32 to vector<8x64xf32>
    %361 = arith.mulf %360, %359 : vector<8x64xf32>
    %cst_141 = arith.constant 4.471500e-02 : f32
    %362 = vector.broadcast %cst_141 : f32 to vector<8x64xf32>
    %363 = arith.mulf %362, %359 : vector<8x64xf32>
    %364 = arith.mulf %363, %359 : vector<8x64xf32>
    %365 = arith.mulf %364, %359 : vector<8x64xf32>
    %366 = arith.addf %359, %365 : vector<8x64xf32>
    %cst_142 = arith.constant 0.797884583 : f32
    %367 = vector.broadcast %cst_142 : f32 to vector<8x64xf32>
    %368 = arith.mulf %367, %366 : vector<8x64xf32>
    %369 = math.tanh %368 : vector<8x64xf32>
    %cst_143 = arith.constant 1.000000e+00 : f32
    %370 = vector.broadcast %cst_143 : f32 to vector<8x64xf32>
    %371 = arith.addf %370, %369 : vector<8x64xf32>
    %372 = arith.mulf %361, %371 : vector<8x64xf32>
    %c1_144 = arith.constant 1 : index
    %c0_145 = arith.constant 0 : index
    %c0_146 = arith.constant 0 : index
    %373 = vector.load %arg13[%c1_144, %c0_145, %c0_146] : memref<2x64x32xbf16, #tpu.memory_space<vmem>>, vector<1x64x32xbf16>
    %374 = vector.shape_cast %373 : vector<1x64x32xbf16> to vector<64x32xbf16>
    %375 = arith.truncf %372 : vector<8x64xf32> to vector<8x64xbf16>
    %cst_147 = arith.constant dense<0.000000e+00> : vector<8x32xf32>
    %376 = tpu.matmul %375, %374, %cst_147 {dimension_numbers = #tpu.dot_dimension_numbers<[1], [0], [0], [1], [0, 0, 1, 1], [], []>} : vector<8x64xbf16>, vector<64x32xbf16>, vector<8x32xf32> -> vector<8x32xf32>
    %c1_148 = arith.constant 1 : index
    %c0_149 = arith.constant 0 : index
    %c0_150 = arith.constant 0 : index
    %377 = vector.load %arg14[%c1_148, %c0_149, %c0_150] : memref<2x1x32xf32, #tpu.memory_space<vmem>>, vector<1x1x32xf32>
    %378 = vector.shape_cast %377 : vector<1x1x32xf32> to vector<1x32xf32>
    %379 = vector.broadcast %378 : vector<1x32xf32> to vector<8x32xf32>
    %380 = arith.addf %376, %379 : vector<8x32xf32>
    %381 = arith.addf %351, %380 : vector<8x32xf32>
    %c1_151 = arith.constant 1 : index
    %c0_152 = arith.constant 0 : index
    %c0_153 = arith.constant 0 : index
    %382 = vector.load %arg15[%c1_151, %c0_152, %c0_153] : memref<2x1x32xf32, #tpu.memory_space<vmem>>, vector<1x1x32xf32>
    %383 = vector.shape_cast %382 : vector<1x1x32xf32> to vector<1x32xf32>
    %c1_154 = arith.constant 1 : index
    %c0_155 = arith.constant 0 : index
    %c0_156 = arith.constant 0 : index
    %384 = vector.load %arg16[%c1_154, %c0_155, %c0_156] : memref<2x1x32xf32, #tpu.memory_space<vmem>>, vector<1x1x32xf32>
    %385 = vector.shape_cast %384 : vector<1x1x32xf32> to vector<1x32xf32>
    %cst_157 = arith.constant dense<0.000000e+00> : vector<8xf32>
    %386 = vector.multi_reduction <add>, %381, %cst_157 [1] : vector<8x32xf32> to vector<8xf32>
    %387 = vector.shape_cast %386 : vector<8xf32> to vector<8x1xf32>
    %cst_158 = arith.constant 3.200000e+01 : f32
    %388 = vector.broadcast %cst_158 : f32 to vector<8x1xf32>
    %389 = arith.divf %387, %388 : vector<8x1xf32>
    %390 = vector.broadcast %389 : vector<8x1xf32> to vector<8x32xf32>
    %391 = arith.subf %381, %390 : vector<8x32xf32>
    %392 = arith.mulf %391, %391 : vector<8x32xf32>
    %cst_159 = arith.constant dense<0.000000e+00> : vector<8xf32>
    %393 = vector.multi_reduction <add>, %392, %cst_159 [1] : vector<8x32xf32> to vector<8xf32>
    %394 = vector.shape_cast %393 : vector<8xf32> to vector<8x1xf32>
    %cst_160 = arith.constant 3.200000e+01 : f32
    %395 = vector.broadcast %cst_160 : f32 to vector<8x1xf32>
    %396 = arith.divf %394, %395 : vector<8x1xf32>
    %397 = vector.broadcast %389 : vector<8x1xf32> to vector<8x32xf32>
    %398 = arith.subf %381, %397 : vector<8x32xf32>
    %cst_161 = arith.constant 9.99999996E-13 : f32
    %399 = vector.broadcast %cst_161 : f32 to vector<8x1xf32>
    %400 = arith.addf %396, %399 : vector<8x1xf32>
    %401 = math.rsqrt %400 : vector<8x1xf32>
    %402 = vector.broadcast %401 : vector<8x1xf32> to vector<8x32xf32>
    %403 = arith.mulf %398, %402 : vector<8x32xf32>
    %404 = vector.broadcast %383 : vector<1x32xf32> to vector<8x32xf32>
    %405 = arith.mulf %403, %404 : vector<8x32xf32>
    %406 = vector.broadcast %385 : vector<1x32xf32> to vector<8x32xf32>
    %407 = arith.addf %405, %406 : vector<8x32xf32>
    %408 = vector.extract_strided_slice %407 {offsets = [0, 0], sizes = [1, 32], strides = [1, 1]} : vector<8x32xf32> to vector<1x32xf32>
    %c0_162 = arith.constant 0 : index
    %c0_163 = arith.constant 0 : index
    %409 = vector.load %arg17[%c0_162, %c0_163] : memref<32x32xbf16, #tpu.memory_space<vmem>>, vector<32x32xbf16>
    %410 = arith.truncf %408 : vector<1x32xf32> to vector<1x32xbf16>
    %cst_164 = arith.constant dense<0.000000e+00> : vector<1x32xf32>
    %411 = tpu.matmul %410, %409, %cst_164 {dimension_numbers = #tpu.dot_dimension_numbers<[1], [0], [0], [1], [0, 0, 1, 1], [], []>} : vector<1x32xbf16>, vector<32x32xbf16>, vector<1x32xf32> -> vector<1x32xf32>
    %c0_165 = arith.constant 0 : index
    %c0_166 = arith.constant 0 : index
    %412 = vector.load %arg18[%c0_165, %c0_166] : memref<1x32xf32, #tpu.memory_space<vmem>>, vector<1x32xf32>
    %413 = arith.addf %411, %412 : vector<1x32xf32>
    %cst_167 = arith.constant 5.000000e-01 : f32
    %414 = vector.broadcast %cst_167 : f32 to vector<1x32xf32>
    %415 = arith.mulf %414, %413 : vector<1x32xf32>
    %cst_168 = arith.constant 4.471500e-02 : f32
    %416 = vector.broadcast %cst_168 : f32 to vector<1x32xf32>
    %417 = arith.mulf %416, %413 : vector<1x32xf32>
    %418 = arith.mulf %417, %413 : vector<1x32xf32>
    %419 = arith.mulf %418, %413 : vector<1x32xf32>
    %420 = arith.addf %413, %419 : vector<1x32xf32>
    %cst_169 = arith.constant 0.797884583 : f32
    %421 = vector.broadcast %cst_169 : f32 to vector<1x32xf32>
    %422 = arith.mulf %421, %420 : vector<1x32xf32>
    %423 = math.tanh %422 : vector<1x32xf32>
    %cst_170 = arith.constant 1.000000e+00 : f32
    %424 = vector.broadcast %cst_170 : f32 to vector<1x32xf32>
    %425 = arith.addf %424, %423 : vector<1x32xf32>
    %426 = arith.mulf %415, %425 : vector<1x32xf32>
    %c0_171 = arith.constant 0 : index
    %c0_172 = arith.constant 0 : index
    %427 = vector.load %arg19[%c0_171, %c0_172] : memref<32x2xbf16, #tpu.memory_space<vmem>>, vector<32x2xbf16>
    %428 = arith.truncf %426 : vector<1x32xf32> to vector<1x32xbf16>
    %cst_173 = arith.constant dense<0.000000e+00> : vector<1x2xf32>
    %429 = tpu.matmul %428, %427, %cst_173 {dimension_numbers = #tpu.dot_dimension_numbers<[1], [0], [0], [1], [0, 0, 1, 1], [], []>} : vector<1x32xbf16>, vector<32x2xbf16>, vector<1x2xf32> -> vector<1x2xf32>
    %c0_174 = arith.constant 0 : index
    %c0_175 = arith.constant 0 : index
    %430 = vector.load %arg20[%c0_174, %c0_175] : memref<1x2xf32, #tpu.memory_space<vmem>>, vector<1x2xf32>
    %431 = arith.addf %429, %430 : vector<1x2xf32>
    %cst_176 = arith.constant dense<0xFF800000> : vector<1xf32>
    %432 = vector.multi_reduction <maximumf>, %431, %cst_176 [1] : vector<1x2xf32> to vector<1xf32>
    %433 = vector.shape_cast %432 : vector<1xf32> to vector<1x1xf32>
    %434 = vector.broadcast %433 : vector<1x1xf32> to vector<1x2xf32>
    %435 = arith.subf %431, %434 : vector<1x2xf32>
    %436 = math.exp %435 : vector<1x2xf32>
    %cst_177 = arith.constant dense<0.000000e+00> : vector<1xf32>
    %437 = vector.multi_reduction <add>, %436, %cst_177 [1] : vector<1x2xf32> to vector<1xf32>
    %438 = vector.shape_cast %437 : vector<1xf32> to vector<1x1xf32>
    %439 = vector.broadcast %438 : vector<1x1xf32> to vector<1x2xf32>
    %440 = arith.divf %436, %439 : vector<1x2xf32>
    %c0_178 = arith.constant 0 : index
    %c0_179 = arith.constant 0 : index
    %c0_180 = arith.constant 0 : index
    %441 = vector.load %arg21[%c0_178, %c0_179, %c0_180] : memref<1x1x2xf32, #tpu.memory_space<vmem>>, vector<1x1x2xf32>
    %442 = vector.shape_cast %441 : vector<1x1x2xf32> to vector<1x2xf32>
    %443 = vector.shape_cast %440 : vector<1x2xf32> to vector<1x1x2xf32>
    tpu.vector_store %arg21[%c0_178, %c0_179, %c0_180], %443 {strides = array<i32>} : memref<1x1x2xf32, #tpu.memory_space<vmem>>, vector<1x1x2xf32>,
    return
  }
  func.func @transform_0(%arg0: i32) -> (i32, i32, i32) {
    %c0_i32 = arith.constant 0 : i32
    %c0_i32_0 = arith.constant 0 : i32
    %c0_i32_1 = arith.constant 0 : i32
    return %arg0, %c0_i32, %c0_i32_0 : i32, i32, i32
  }
  func.func @transform_1(%arg0: i32) -> (i32, i32, i32) {
    %c0_i32 = arith.constant 0 : i32
    %c0_i32_0 = arith.constant 0 : i32
    %c0_i32_1 = arith.constant 0 : i32
    return %arg0, %c0_i32, %c0_i32_0 : i32, i32, i32
  }
  func.func @transform_2(%arg0: i32) -> (i32, i32) {
    %c0_i32 = arith.constant 0 : i32
    %c0_i32_0 = arith.constant 0 : i32
    %c0_i32_1 = arith.constant 0 : i32
    return %c0_i32, %c0_i32_0 : i32, i32
  }
  func.func @transform_3(%arg0: i32) -> (i32, i32) {
    %c0_i32 = arith.constant 0 : i32
    %c0_i32_0 = arith.constant 0 : i32
    %c0_i32_1 = arith.constant 0 : i32
    return %c0_i32, %c0_i32_0 : i32, i32
  }
  func.func @transform_4(%arg0: i32) -> (i32, i32, i32) {
    %c0_i32 = arith.constant 0 : i32
    %c0_i32_0 = arith.constant 0 : i32
    %c0_i32_1 = arith.constant 0 : i32
    %c0_i32_2 = arith.constant 0 : i32
    return %c0_i32, %c0_i32_0, %c0_i32_1 : i32, i32, i32
  }
  func.func @transform_5(%arg0: i32) -> (i32, i32, i32) {
    %c0_i32 = arith.constant 0 : i32
    %c0_i32_0 = arith.constant 0 : i32
    %c0_i32_1 = arith.constant 0 : i32
    %c0_i32_2 = arith.constant 0 : i32
    return %c0_i32, %c0_i32_0, %c0_i32_1 : i32, i32, i32
  }
  func.func @transform_6(%arg0: i32) -> (i32, i32, i32) {
    %c0_i32 = arith.constant 0 : i32
    %c0_i32_0 = arith.constant 0 : i32
    %c0_i32_1 = arith.constant 0 : i32
    %c0_i32_2 = arith.constant 0 : i32
    return %c0_i32, %c0_i32_0, %c0_i32_1 : i32, i32, i32
  }
  func.func @transform_7(%arg0: i32) -> (i32, i32, i32) {
    %c0_i32 = arith.constant 0 : i32
    %c0_i32_0 = arith.constant 0 : i32
    %c0_i32_1 = arith.constant 0 : i32
    %c0_i32_2 = arith.constant 0 : i32
    return %c0_i32, %c0_i32_0, %c0_i32_1 : i32, i32, i32
  }
  func.func @transform_8(%arg0: i32) -> (i32, i32, i32) {
    %c0_i32 = arith.constant 0 : i32
    %c0_i32_0 = arith.constant 0 : i32
    %c0_i32_1 = arith.constant 0 : i32
    %c0_i32_2 = arith.constant 0 : i32
    return %c0_i32, %c0_i32_0, %c0_i32_1 : i32, i32, i32
  }
  func.func @transform_9(%arg0: i32) -> (i32, i32, i32) {
    %c0_i32 = arith.constant 0 : i32
    %c0_i32_0 = arith.constant 0 : i32
    %c0_i32_1 = arith.constant 0 : i32
    %c0_i32_2 = arith.constant 0 : i32
    return %c0_i32, %c0_i32_0, %c0_i32_1 : i32, i32, i32
  }
  func.func @transform_10(%arg0: i32) -> (i32, i32, i32) {
    %c0_i32 = arith.constant 0 : i32
    %c0_i32_0 = arith.constant 0 : i32
    %c0_i32_1 = arith.constant 0 : i32
    %c0_i32_2 = arith.constant 0 : i32
    return %c0_i32, %c0_i32_0, %c0_i32_1 : i32, i32, i32
  }
  func.func @transform_11(%arg0: i32) -> (i32, i32, i32) {
    %c0_i32 = arith.constant 0 : i32
    %c0_i32_0 = arith.constant 0 : i32
    %c0_i32_1 = arith.constant 0 : i32
    %c0_i32_2 = arith.constant 0 : i32
    return %c0_i32, %c0_i32_0, %c0_i32_1 : i32, i32, i32
  }
  func.func @transform_12(%arg0: i32) -> (i32, i32, i32) {
    %c0_i32 = arith.constant 0 : i32
    %c0_i32_0 = arith.constant 0 : i32
    %c0_i32_1 = arith.constant 0 : i32
    %c0_i32_2 = arith.constant 0 : i32
    return %c0_i32, %c0_i32_0, %c0_i32_1 : i32, i32, i32
  }
  func.func @transform_13(%arg0: i32) -> (i32, i32, i32) {
    %c0_i32 = arith.constant 0 : i32
    %c0_i32_0 = arith.constant 0 : i32
    %c0_i32_1 = arith.constant 0 : i32
    %c0_i32_2 = arith.constant 0 : i32
    return %c0_i32, %c0_i32_0, %c0_i32_1 : i32, i32, i32
  }
  func.func @transform_14(%arg0: i32) -> (i32, i32, i32) {
    %c0_i32 = arith.constant 0 : i32
    %c0_i32_0 = arith.constant 0 : i32
    %c0_i32_1 = arith.constant 0 : i32
    %c0_i32_2 = arith.constant 0 : i32
    return %c0_i32, %c0_i32_0, %c0_i32_1 : i32, i32, i32
  }
  func.func @transform_15(%arg0: i32) -> (i32, i32, i32) {
    %c0_i32 = arith.constant 0 : i32
    %c0_i32_0 = arith.constant 0 : i32
    %c0_i32_1 = arith.constant 0 : i32
    %c0_i32_2 = arith.constant 0 : i32
    return %c0_i32, %c0_i32_0, %c0_i32_1 : i32, i32, i32
  }
  func.func @transform_16(%arg0: i32) -> (i32, i32) {
    %c0_i32 = arith.constant 0 : i32
    %c0_i32_0 = arith.constant 0 : i32
    %c0_i32_1 = arith.constant 0 : i32
    return %c0_i32, %c0_i32_0 : i32, i32
  }
  func.func @transform_17(%arg0: i32) -> (i32, i32) {
    %c0_i32 = arith.constant 0 : i32
    %c0_i32_0 = arith.constant 0 : i32
    %c0_i32_1 = arith.constant 0 : i32
    return %c0_i32, %c0_i32_0 : i32, i32
  }
  func.func @transform_18(%arg0: i32) -> (i32, i32) {
    %c0_i32 = arith.constant 0 : i32
    %c0_i32_0 = arith.constant 0 : i32
    %c0_i32_1 = arith.constant 0 : i32
    return %c0_i32, %c0_i32_0 : i32, i32
  }
  func.func @transform_19(%arg0: i32) -> (i32, i32) {
    %c0_i32 = arith.constant 0 : i32
    %c0_i32_0 = arith.constant 0 : i32
    %c0_i32_1 = arith.constant 0 : i32
    return %c0_i32, %c0_i32_0 : i32, i32
  }
  func.func @transform_20(%arg0: i32) -> (i32, i32, i32) {
    %c0_i32 = arith.constant 0 : i32
    %c0_i32_0 = arith.constant 0 : i32
    %c0_i32_1 = arith.constant 0 : i32
    return %arg0, %c0_i32, %c0_i32_0 : i32, i32, i32
  }
}

</mosaic_0001>

<bundles_post_ra>
// kernel: electra_bad_classifier_forward.1
= control target key start
LH: loop header
LB: loop body
LE: loop exit
PB: predicated region body
PF: predicated region fallthrough
CT: control target
= control target key end

     0   :  { %s3705_s0 = inlined_call_operand.vmem [shape: f32[2,8,32], index: 0, kind: input, shape index: {}]   ;;  %s3706_s1 = inlined_call_operand.vmem [shape: f32[2,1,8], index: 1, kind: input, shape index: {}]   ;;  %s3707_s2 = inlined_call_operand.vmem [shape: f32[1,32], index: 2, kind: input, shape index: {}]   ;;  %s3708_s3 = inlined_call_operand.vmem [shape: f32[1,32], index: 3, kind: input, shape index: {}]   ;;  %s3709_s4 = inlined_call_operand.vmem [shape: bf16[2,32,96], index: 4, kind: input, shape index: {}]   ;;  %s3710_s5 = inlined_call_operand.vmem [shape: f32[2,1,96], index: 5, kind: input, shape index: {}]   ;;  %s3711_s6 = inlined_call_operand.vmem [shape: bf16[2,32,32], index: 6, kind: input, shape index: {}]   ;;  %s3712_s7 = inlined_call_operand.vmem [shape: f32[2,1,32], index: 7, kind: input, shape index: {}]   ;;  %s3713_s8 = inlined_call_operand.vmem [shape: f32[2,1,32], index: 8, kind: input, shape index: {}]   ;;  %s3714_s9 = inlined_call_operand.vmem [shape: f32[2,1,32], index: 9, kind: input, shape index: {}]   ;;  %s3715_s10 = inlined_call_operand.vmem [shape: bf16[2,32,64], index: 10, kind: input, shape index: {}]   ;;  %s3716_s11 = inlined_call_operand.vmem [shape: f32[2,1,64], index: 11, kind: input, shape index: {}]   ;;  %s3717_s12 = inlined_call_operand.vmem [shape: bf16[2,64,32], index: 12, kind: input, shape index: {}]   ;;  %s3718_s13 = inlined_call_operand.vmem [shape: f32[2,1,32], index: 13, kind: input, shape index: {}]   ;;  %s3719_s14 = inlined_call_operand.vmem [shape: f32[2,1,32], index: 14, kind: input, shape index: {}]   ;;  %s3720_s15 = inlined_call_operand.vmem [shape: f32[2,1,32], index: 15, kind: input, shape index: {}]   ;;  %s3721_s16 = inlined_call_operand.vmem [shape: bf16[32,32], index: 16, kind: input, shape index: {}]   ;;  %s3722_s17 = inlined_call_operand.vmem [shape: f32[1,32], index: 17, kind: input, shape index: {}]   ;;  %s3723_s18 = inlined_call_operand.vmem [shape: bf16[32,2], index: 18, kind: input, shape index: {}]   ;;  %s3724_s19 = inlined_call_operand.vmem [shape: f32[1,2], index: 19, kind: input, shape index: {}]   ;;  %s3725_s20 = inlined_call_operand.hbm [shape: f32[2,1,2], index: 20, kind: output, shape index: {}]  }
   0x1   :  { %3745 = sst [smem:[#allocation9_spill]] %s3705_s0 }
   0x2   :  { %3746 = sst [smem:[#allocation10_spill]] %s3706_s1 }
   0x3   :  { %3747 = sst [smem:[#allocation11_spill]] %s3707_s2 }
   0x4   :  { %3748 = sst [smem:[#allocation12_spill]] %s3708_s3 }
   0x5   :  { %3749 = sst [smem:[#allocation13_spill]] %s3709_s4 }
   0x6   :  { %3750 = sst [smem:[#allocation14_spill]] %s3710_s5 }
   0x7   :  { %25 = vsyncpa [#allocation3], 0 }
   0x8   :  { %27 = vsyncpa [#allocation3 + $0x1], 0  ;;  %s3221_s1 = smov 0   ;;  %s3223_s22 = smov 0  }
   0x9   :  { %s3225_s23 = smov 0   ;;  %s3227_s24 = smov 0  }
   0xa LB: > { %3751 = sst [smem:[#allocation5_spill]] %s3093_s23  ;;  %s3242_s2 = sadd.s32 4294967295, %s3097_s24   ;;  %s3097_s24 = sphi %s3227_s24, %s3777_s24   ;;  %s3093_s23 = sphi %s3225_s23, %s3779_s23   ;;  %s3089_s22 = sphi %s3223_s22, %s3781_s22   ;;  %s3085_s1 = sphi %s3221_s1, %s3780_s1  }
   0xb   : > { %s2550_s25 = sadd.s32 4294967294, %s3097_s24   ;;  %s3246_s3 = sadd.s32 1, %s3097_s24  }
   0xc   : > { %3752 = sst [smem:[#allocation6_spill]] %s3246_s3  ;;  %s470_s26 = sadd.s32 1, %s3093_s23 }
   0xd   : > { %s467_s27 = ssub.s32 %s3097_s24, %s3246_s3  ;;  %p480_p0 = scmp.ne.s32.totalorder %s3093_s23, %s3089_s22 }
   0xe   : > { %p468_p1 = scmp.eq.s32.totalorder %s467_s27, 0  ;;  %p481_p2 = scmp.eq.s32.totalorder %s3242_s2, 1 }
   0xf   : > { %p486_p3 = scmp.ne.s32.totalorder %s3089_s22, %s3085_s1  ;;  %p487_p4 = scmp.eq.s32.totalorder %s2550_s25, 1 }
  0x10   : > { %s3257_s28 = scalar_select %p468_p1, %s3093_s23, %s470_s26  }
  0x11   : > { %p3259_p5 = por %p481_p2, %p480_p0  ;;  %p3263_p6 = por %p487_p4, %p486_p3 }
  0x12   : > { %3753 = sst [smem:[#allocation7_spill]] %s3257_s28  ;;  %p2553_p7 = scmp.ge.s32.totalorder %s3097_s24, 1 }
  0x13   : > { %s3755_s29 = scalar_select %p3263_p6, 1, 0 }
  0x14   : > { %p572_p8 = scmp.lt.s32.totalorder %s3097_s24, 3 }
  0x15   : > { %3756 = sst [smem:[#allocation8_spill]] %s3755_s29 }
  0x16   : > { %p573_p9 = pnand %p2553_p7, %p572_p8 }
  0x17   : > { %p631_p10 = scmp.lt.s32.totalorder (!%p573_p9), %s3242_s2, 1  ;;  %vm642_vm0 = vcmask (!%p573_p9), 261120   ;;  %s3757_s26 = sld [smem:[#allocation9_spill]] (!%p573_p9)  ;;  %v3099_v8 = vmov (!%p573_p9), 0.0   ;;  %vm3100_vm1 = vmmov (!%p573_p9), 0   ;;  %vm745_vm2 = vcmask (!%p573_p9), 64512  }
  0x18   : > { %576 = sbr.rel (%p573_p9) target bundleno = 6264 (0x1878), region = 100  ;;  %s3758_s3 = sld [smem:[#allocation13_spill]] (!%p573_p9)  ;;  %2720 = vmatprep.subr.bf16.mxu0 (!%p573_p9), %v3099_v8  ;;  %2728 = vmatprep.subr.bf16.mxu1 (!%p573_p9), %v3099_v8  ;;  %v794_v38 = vlaneseq (!%p573_p9)  ;;  %vm817_vm3 = vcmask (!%p573_p9), 1043456   ;;  %vm1210_vm4 = vcmask (!%p573_p9), 130048   ;;  %vm1212_vm5 = vcmask (!%p573_p9), 195584  }
  0x19   : > { %2724 = vmatprep.mubr.msk.bf16.mxu0 (!%p573_p9), %vm3100_vm1, %v3099_v8  ;;  %2730 = vmatprep.mubr.msk.bf16.mxu1 (!%p573_p9), %vm3100_vm1, %v3099_v8  ;;  %s3759_s25 = sld [smem:[#allocation11_spill]] (!%p573_p9)  ;;  %s3761_s5 = sld [smem:[#allocation14_spill]] (!%p573_p9)  ;;  %vm1427_vm6 = vcmask (!%p573_p9), 523264   ;;  %vm2460_vm7 = vcmask (!%p573_p9), 8192  }
  0x1a   : > { %s3742_s23 = smov (!%p573_p9), 120   ;;  %s3743_s28 = smov (!%p573_p9), 96   ;;  %v795_v41 = vshrl.u32 (!%p573_p9), %v794_v38, 7 }
  0x1b   : > { %s3738_s29 = smov (!%p573_p9), 80   ;;  %s3741_s21 = smov (!%p573_p9), 8  }
  0x1c   : > { %v796_v43 = vsub.s32 (!%p573_p9), 0, %v795_v41 }
  0x1e   : > { %v2959_v7 = vld [vmem:[%s3758_s3] sm:$0xff] (!%p573_p9)   ;;  %v2960_v9 = vld [vmem:[%s3758_s3 + $0x8] sm:$0xff] (!%p573_p9)  }
  0x1f   : > { %s3271_s30 = scalar_select %p631_p10, %s3242_s2, 1  ;;  %2721 = vmatpush3.bf16.msra.mxu0 %v2959_v7  ;;  %v2555_v14 = vld [vmem:[%s3759_s25] ss:$0 sm:$0xff] }
  0x20   : > { %2722 = vmatprep.subr.bf16.mxu0 %v3099_v8  ;;  %v2557_v20 = vld [vmem:[%s3761_s5] ss:$0 sm:$0xff]  ;;  %s3103_s25 = smov 88  }
  0x21   : > { %s2554_s0 = sshll.u32 %s3271_s30, 3 }
  0x22   : > { %s634_s27 = scalar_lea.vmem %s3757_s26, %s2554_s0  ;;  %s3760_s0 = sld [smem:[#allocation12_spill]] }
  0x23   : > { %v639_v0 = vld [vmem:[%s634_s27] sm:$0xff]  ;;  %2723 = vmatpush3.bf16.msra.mxu0 %v2960_v9  ;;  %s3733_s26 = smov 112   ;;  %s3732_s27 = smov 72  }
  0x24   : > { %v643_v1 = vsel %vm642_vm0, %v639_v0, 0.0  ;;  %2734 = vmatprep.subr.bf16.mxu0 %v3099_v8 }
  0x25   : > { %644 = vadd.xlane.f32.xlu0 %v643_v1 }
  0x28   : > { %v2556_v16 = vld [vmem:[%s3760_s0] ss:$0 sm:$0xff]  ;;  %s3731_s0 = smov 104  }
  0xb2   : > { %v645_v2 = vpop.xlane.xlu0 %644 }
  0xb3   : > { %v647_v3 = vmul.f32 0.03125, %v645_v2 }
  0xb5   : > { %v648_v4 = vsub.f32 %v639_v0, %v647_v3 }
  0xb7   : > { %v649_v5 = vmul.f32 %v648_v4, %v648_v4 }
  0xb9   : > { %v650_v6 = vsel %vm642_vm0, %v649_v5, 0.0 }
  0xba   : > { %651 = vadd.xlane.f32.xlu0 %v650_v6 }
 0x147   : > { %v652_v10 = vpop.xlane.xlu0 %651 }
 0x148   : > { %v653_v11 = vmul.f32 0.03125, %v652_v10 }
 0x14a   : > { %v654_v12 = vadd.f32 1e-12, %v653_v11 }
 0x14c   : > { %2983 = vrsqrt.f32 %v654_v12 }
 0x156   : > { %v2984_v13 = vpop.eup %2983 }
 0x157   : > { %v656_v15 = vmul.f32 %v2984_v13, %v648_v4 }
 0x159   : > { %v663_v17 = vmul.f32 %v2555_v14, %v656_v15 }
 0x15b   : > { %v3299_v18 = vadd.f32 %v2556_v16, %v663_v17 }
 0x15d   : > { %v678_v19 = vpack.c.bf16 %v3299_v18, %v3299_v18 }
 0x15f   : > { %2725 = vmatmul.mubr.msk.bf16.vlgmr.msra.gmra.mrb[0].mxu0 %vm642_vm0, %v678_v19 }
 0x160   : > { %2736 = vmatprep.mubr.msk.bf16.mxu0 %vm3100_vm1, %v3099_v8 }
 0x232   : > { %v735_v21 = vpop.f32.mrb[0].mxu0 }
 0x233   : > { %v736_v22 = vadd.f32 %v2557_v20, %v735_v21  ;;  %v2726_v23 = vpop.f32.mrb[1].mxu0 }
 0x234   : > { %v738_v24 = vpop.f32.mrb[2].mxu0 }
 0x235   : > { %v3309_v25 = vpack.c.bf16 %v736_v22, %v736_v22  ;;  %v2727_v26 = vpop.f32.mrb[3].mxu0 }
 0x237   : > { %861 = vrot.lane.b32.xlu0 %v3309_v25, %s3742_s23  ;;  %743 = vrot.lane.b32.xlu1 %v3309_v25, %s3743_s28  ;;  %s3767_s23 = smov 72   ;;  %s3768_s28 = smov 104  }
 0x23b   : > { %863 = vrot.lane.b32.xlu1 %v3309_v25, %s3103_s25 }
 0x23f   : > { %975 = vrot.lane.b32.xlu1 %v3309_v25, %s3738_s29  ;;  %s3740_s29 = smov 16  }
 0x243   : > { %973 = vrot.lane.b32.xlu1 %v3309_v25, %s3733_s26 }
 0x247   : > { %1087 = vrot.lane.b32.xlu1 %v3309_v25, %s3732_s27  ;;  %s3762_s27 = sld [smem:[#allocation10_spill]] }
 0x24b   : > { %1085 = vrot.lane.b32.xlu1 %v3309_v25, %s3731_s0  ;;  %s3734_s0 = smov 40  }
 0x24d   : > { %s637_s26 = scalar_lea.vmem %s3762_s27, %s3271_s30  ;;  %s3737_s30 = smov 64  }
 0x24e   : > { %v671_v39 = vld [vmem:[%s637_s26] sm:$0x1]  ;;  %s3736_s26 = smov 56   ;;  %s3735_s27 = smov 48  }
 0x24f   : > { %v672_v40 = vsub.f32 1.0, %v671_v39 }
 0x251   : > { %v673_v42 = vmul.f32 -10000.0, %v672_v40 }
 0x253   : > { %v3350_v44 = vrot.slane %v673_v42, %v796_v43 }
 0x2a9   : > { %v744_v27 = vpop.permute.xlu1 %743  ;;  %v862_v32 = vpop.permute.xlu0 %861 }
 0x2aa   : > { %v750_v28 = vsel %vm745_vm2, %v744_v27, 0 }
 0x2ab   : > { %2729 = vmatpush3.bf16.xpose.msra.mxu1 %v750_v28 }
 0x2ac   : > { %2740 = vmatprep.subr.bf16.mxu1 %v3099_v8 }
 0x2ad   : > { %v864_v29 = vpop.permute.xlu1 %863 }
 0x2ae   : > { %v869_v30 = vsel %vm745_vm2, %v864_v29, 0 }
 0x2b1   : > { %v976_v31 = vpop.permute.xlu1 %975 }
 0x2b2   : > { %2731 = vmatmul.mubr.msk.bf16.vlgmr.msra.gmra.mrb[0].mxu1 %vm745_vm2, %v3309_v25  ;;  %v981_v34 = vsel %vm745_vm2, %v976_v31, 0 }
 0x2b3   : > { %2741 = vmatpush3.bf16.xpose.msra.mxu1 %v869_v30  ;;  %2742 = vmatprep.mubr.msk.bf16.mxu1 %vm3100_vm1, %v3099_v8 }
 0x2b4   : > { %2752 = vmatprep.subr.bf16.mxu1 %v3099_v8 }
 0x2b5   : > { %v974_v33 = vpop.permute.xlu1 %973 }
 0x2b9   : > { %v1088_v35 = vpop.permute.xlu1 %1087 }
 0x2ba   : > { %2743 = vmatmul.mubr.msk.bf16.vlgmr.msra.gmra.mrb[4].mxu1 %vm745_vm2, %v862_v32  ;;  %v1093_v36 = vsel %vm745_vm2, %v1088_v35, 0 }
 0x2bb   : > { %2753 = vmatpush3.bf16.xpose.msra.mxu1 %v981_v34  ;;  %2754 = vmatprep.mubr.msk.bf16.mxu1 %vm3100_vm1, %v3099_v8 }
 0x2bc   : > { %2764 = vmatprep.subr.bf16.mxu1 %v3099_v8 }
 0x2bd   : > { %v1086_v37 = vpop.permute.xlu1 %1085 }
 0x2c2   : > { %2755 = vmatmul.mubr.msk.bf16.vlgmr.msra.gmra.mrb[8].mxu1 %vm745_vm2, %v974_v33 }
 0x2c3   : > { %2765 = vmatpush3.bf16.xpose.msra.mxu1 %v1093_v36  ;;  %2766 = vmatprep.mubr.msk.bf16.mxu1 %vm3100_vm1, %v3099_v8 }
 0x2c4   : > { %2776 = vmatprep.subr.bf16.mxu1 %v3099_v8 }
 0x2ca   : > { %2767 = vmatmul.mubr.msk.bf16.vlgmr.msra.gmra.mrb[12].mxu1 %vm745_vm2, %v1086_v37 }
 0x2cb   : > { %2780 = vmatprep.mubr.msk.bf16.mxu1 %vm3100_vm1, %v3099_v8 }
 0x385   : > { %v786_v45 = vpop.f32.mrb[0].mxu1 }
 0x386   : > { %v792_v46 = vmul.f32 0.35355338, %v786_v45  ;;  %v2732_v47 = vpop.f32.mrb[1].mxu1 }
 0x387   : > { %v789_v48 = vpop.f32.mrb[2].mxu1 }
 0x388   : > { %v2733_v49 = vpop.f32.mrb[3].mxu1  ;;  %v799_v50 = vadd.f32 %v3350_v44, %v792_v46 }
 0x38a   : > { %v800_v51 = vsel %vm745_vm2, %v799_v50, -inf }
 0x38b   : > { %801 = vmax.xlane.f32.xlu1 %v800_v51 }
 0x38d   : > { %v905_v52 = vpop.f32.mrb[4].mxu1 }
 0x38e   : > { %v911_v53 = vmul.f32 0.35355338, %v905_v52  ;;  %v2744_v54 = vpop.f32.mrb[5].mxu1 }
 0x38f   : > { %v908_v55 = vpop.f32.mrb[6].mxu1 }
 0x390   : > { %v2745_v56 = vpop.f32.mrb[7].mxu1  ;;  %v912_v57 = vadd.f32 %v911_v53, %v3350_v44 }
 0x392   : > { %v913_v58 = vsel %vm745_vm2, %v912_v57, -inf }
 0x393   : > { %914 = vmax.xlane.f32.xlu0 %v913_v58 }
 0x395   : > { %v1017_v59 = vpop.f32.mrb[8].mxu1 }
 0x396   : > { %v1023_v60 = vmul.f32 0.35355338, %v1017_v59  ;;  %v2756_v61 = vpop.f32.mrb[9].mxu1 }
 0x397   : > { %v1020_v62 = vpop.f32.mrb[10].mxu1 }
 0x398   : > { %v2757_v63 = vpop.f32.mrb[11].mxu1  ;;  %v1024_v0 = vadd.f32 %v1023_v60, %v3350_v44 }
 0x39a   : > { %v1025_v1 = vsel %vm745_vm2, %v1024_v0, -inf }
 0x39b   : > { %1026 = vmax.xlane.f32.xlu1 %v1025_v1  ;;  %v2962_v1 = vld [vmem:[%s3711_s6 + $0x8] sm:$0xff]  }
 0x39d   : > { %v1129_v2 = vpop.f32.mrb[12].mxu1 }
 0x39e   : > { %v1135_v3 = vmul.f32 0.35355338, %v1129_v2  ;;  %v2768_v4 = vpop.f32.mrb[13].mxu1 }
 0x39f   : > { %v1132_v5 = vpop.f32.mrb[14].mxu1 }
 0x3a0   : > { %v2769_v6 = vpop.f32.mrb[15].mxu1  ;;  %v1136_v7 = vadd.f32 %v1135_v3, %v3350_v44 }
 0x3a2   : > { %v1137_v9 = vsel %vm745_vm2, %v1136_v7, -inf }
 0x3a3   : > { %1138 = vmax.xlane.f32.xlu0 %v1137_v9 }
 0x418   : > { %v802_v10 = vpop.xlane.xlu1 %801 }
 0x419   : > { %v803_v11 = vsub.f32 %v799_v50, %v802_v10 }
 0x41b   : > { %v804_v12 = vmul.f32 1.442695, %v803_v11 }
 0x41d   : > { %2985 = vpow2.f32 %v804_v12 }
 0x420   : > { %v915_v13 = vpop.xlane.xlu0 %914 }
 0x421   : > { %v916_v14 = vsub.f32 %v912_v57, %v915_v13 }
 0x423   : > { %v917_v15 = vmul.f32 1.442695, %v916_v14 }
 0x425   : > { %2987 = vpow2.f32 %v917_v15 }
 0x427   : > { %v2986_v16 = vpop.eup %2985 }
 0x428   : > { %v806_v17 = vsel %vm745_vm2, %v2986_v16, 0.0  ;;  %v1027_v27 = vpop.xlane.xlu1 %1026 }
 0x429   : > { %807 = vadd.xlane.f32.xlu1 %v806_v17  ;;  %v1028_v28 = vsub.f32 %v1024_v0, %v1027_v27  ;;  %v2961_v0 = vld [vmem:[%s3711_s6] sm:$0xff]  }
 0x42a   : > { %2777 = vmatpush3.bf16.msra.mxu1 %v2961_v0  ;;  %v2579_v0 = vld [vmem:[%s3718_s13] ss:$0 sm:$0xff] }
 0x42b   : > { %v1029_v29 = vmul.f32 1.442695, %v1028_v28  ;;  %2778 = vmatprep.subr.bf16.mxu1 %v3099_v8 }
 0x42e   : > { %2779 = vmatpush3.bf16.msra.mxu1 %v2962_v1 }
 0x42f   : > { %v2988_v19 = vpop.eup %2987  ;;  %2792 = vmatprep.subr.bf16.mxu1 %v3099_v8 }
 0x430   : > { %v1139_v20 = vpop.xlane.xlu0 %1138  ;;  %v919_v21 = vsel %vm745_vm2, %v2988_v19, 0.0 }
 0x431   : > { %v1140_v22 = vsub.f32 %v1136_v7, %v1139_v20  ;;  %920 = vadd.xlane.f32.xlu0 %v919_v21 }
 0x433   : > { %v1141_v23 = vmul.f32 1.442695, %v1140_v22 }
 0x435   : > { %2989 = vpow2.f32 %v1141_v23 }
 0x436   : > { %2991 = vpow2.f32 %v1029_v29 }
 0x43a   : > { %812 = vrot.lane.b32.xlu1 %v3309_v25, %s3737_s30  ;;  %s3764_s30 = smov 120  }
 0x43f   : > { %v2990_v24 = vpop.eup %2989 }
 0x440   : > { %v1143_v26 = vsel %vm745_vm2, %v2990_v24, 0.0  ;;  %v2992_v30 = vpop.eup %2991 }
 0x441   : > { %1144 = vadd.xlane.f32.xlu0 %v1143_v26  ;;  %v1031_v31 = vsel %vm745_vm2, %v2992_v30, 0.0 }
 0x457   : > { %925 = vrot.lane.b32.xlu0 %v3309_v25, %s3736_s26  ;;  %s3766_s26 = smov 112  }
 0x45e   : > { %1032 = vadd.xlane.f32.xlu1 %v1031_v31 }
 0x46f   : > { %1037 = vrot.lane.b32.xlu1 %v3309_v25, %s3735_s27  ;;  %s3739_s27 = smov 24  }
 0x473   : > { %1149 = vrot.lane.b32.xlu1 %v3309_v25, %s3734_s0  ;;  %s3763_s0 = smov 96  }
 0x4b6   : > { %v808_v32 = vpop.xlane.xlu1 %807 }
 0x4b7   : > { %2993 = vrcp.f32 %v808_v32 }
 0x4ba   : > { %v813_v33 = vpop.permute.xlu1 %812 }
 0x4bb   : > { %v819_v34 = vsel %vm817_vm3, %v813_v33, 0  ;;  %v2963_v33 = vld [vmem:[%s3715_s10] sm:$0xff]  }
 0x4bc   : > { %2735 = vmatpush3.bf16.msra.mxu0 %v819_v34  ;;  %v2964_v34 = vld [vmem:[%s3715_s10 + $0x8] sm:$0xff]  }
 0x4bd   : > { %2746 = vmatprep.subr.bf16.mxu0 %v3099_v8 }
 0x4be   : > { %v921_v36 = vpop.xlane.xlu0 %920 }
 0x4bf   : > { %2995 = vrcp.f32 %v921_v36 }
 0x4c1   : > { %v2994_v35 = vpop.eup %2993 }
 0x4c2   : > { %v810_v37 = vmul.f32 %v2994_v35, %v2986_v16 }
 0x4c4   : > { %v811_v38 = vpack.c.bf16 %v810_v37, %v810_v37 }
 0x4c6   : > { %2737 = vmatmul.mubr.msk.bf16.vlgmr.msra.gmra.mrb[4].mxu0 %vm745_vm2, %v811_v38  ;;  %v2573_v38 = vld [vmem:[%s3713_s8] ss:$0 sm:$0xff] }
 0x4c7   : > { %2748 = vmatprep.mubr.msk.bf16.mxu0 %vm3100_vm1, %v3099_v8 }
 0x4c9   : > { %v2996_v25 = vpop.eup %2995 }
 0x4ca   : > { %v923_v40 = vmul.f32 %v2996_v25, %v2988_v19  ;;  %v2569_v19 = vld [vmem:[%s3712_s7] ss:$0 sm:$0xff] }
 0x4cc   : > { %v924_v43 = vpack.c.bf16 %v923_v40, %v923_v40 }
 0x4ce   : > { %v1145_v39 = vpop.xlane.xlu0 %1144 }
 0x4d2   : > { %v926_v41 = vpop.permute.xlu0 %925 }
 0x4d3   : > { %v931_v42 = vsel %vm817_vm3, %v926_v41, 0 }
 0x4d4   : > { %2747 = vmatpush3.bf16.msra.mxu0 %v931_v42 }
 0x4d5   : > { %2758 = vmatprep.subr.bf16.mxu0 %v3099_v8 }
 0x4d7   : > { %2749 = vmatmul.mubr.msk.bf16.vlgmr.msra.gmra.mrb[8].mxu0 %vm745_vm2, %v924_v43  ;;  %v2965_v43 = vld [vmem:[%s3717_s12] sm:$0xff]  }
 0x4d8   : > { %2760 = vmatprep.mubr.msk.bf16.mxu0 %vm3100_vm1, %v3099_v8 }
 0x4eb   : > { %v1033_v45 = vpop.xlane.xlu1 %1032 }
 0x4ec   : > { %2997 = vrcp.f32 %v1033_v45  ;;  %v2966_v45 = vld [vmem:[%s3717_s12 + $0x8] sm:$0xff]  }
 0x4ed   : > { %2999 = vrcp.f32 %v1145_v39  ;;  %v2574_v39 = vld [vmem:[%s3714_s9] ss:$0 sm:$0xff] }
 0x4ef   : > { %v1038_v46 = vpop.permute.xlu1 %1037 }
 0x4f0   : > { %v1043_v47 = vsel %vm817_vm3, %v1038_v46, 0  ;;  %v2967_v46 = vld [vmem:[%s3717_s12 + $0x10] sm:$0xff]  }
 0x4f1   : > { %2759 = vmatpush3.bf16.msra.mxu0 %v1043_v47  ;;  %v2968_v47 = vld [vmem:[%s3717_s12 + $0x18] sm:$0xff]  }
 0x4f2   : > { %2770 = vmatprep.subr.bf16.mxu0 %v3099_v8 }
 0x4f3   : > { %v1150_v50 = vpop.permute.xlu1 %1149 }
 0x4f4   : > { %v1155_v53 = vsel %vm817_vm3, %v1150_v50, 0 }
 0x4f6   : > { %v2998_v48 = vpop.eup %2997 }
 0x4f7   : > { %v1035_v49 = vmul.f32 %v2998_v48, %v2992_v30  ;;  %v3000_v52 = vpop.eup %2999  ;;  %v2575_v48 = vld [vmem:[%s3716_s11] ss:$0 sm:$0xff] }
 0x4f8   : > { %v1147_v54 = vmul.f32 %v3000_v52, %v2990_v24 }
 0x4f9   : > { %v1036_v51 = vpack.c.bf16 %v1035_v49, %v1035_v49 }
 0x4fa   : > { %v1148_v55 = vpack.c.bf16 %v1147_v54, %v1147_v54 }
 0x4fb   : > { %2761 = vmatmul.mubr.msk.bf16.vlgmr.msra.gmra.mrb[12].mxu0 %vm745_vm2, %v1036_v51 }
 0x4fc   : > { %2771 = vmatpush3.bf16.msra.mxu0 %v1155_v53  ;;  %2772 = vmatprep.mubr.msk.bf16.mxu0 %vm3100_vm1, %v3099_v8 }
 0x4fd   : > { %2784 = vmatprep.subr.bf16.mxu0 %v3099_v8 }
 0x503   : > { %2773 = vmatmul.mubr.msk.bf16.vlgmr.msra.gmra.mrb[16].mxu0 %vm745_vm2, %v1148_v55 }
 0x504   : > { %2788 = vmatprep.mubr.msk.bf16.mxu0 %vm3100_vm1, %v3099_v8  ;;  %2785 = vmatpush3.bf16.msra.mxu0 %v2963_v33 }
 0x505   : > { %2786 = vmatprep.subr.bf16.mxu0 %v3099_v8 }
 0x508   : > { %2787 = vmatpush3.bf16.msra.mxu0 %v2964_v34 }
 0x509   : > { %2804 = vmatprep.subr.bf16.mxu0 %v3099_v8 }
 0x599   : > { %v855_v56 = vpop.f32.mrb[4].mxu0 }
 0x59a   : > { %v2738_v57 = vpop.f32.mrb[5].mxu0 }
 0x59b   : > { %v858_v58 = vpop.f32.mrb[6].mxu0 }
 0x59c   : > { %v2739_v59 = vpop.f32.mrb[7].mxu0 }
 0x5aa   : > { %v967_v60 = vpop.f32.mrb[8].mxu0 }
 0x5ab   : > { %1198 = vrot.lane.b32.xlu0 %v967_v60, %s3741_s21  ;;  %v2750_v61 = vpop.f32.mrb[9].mxu0  ;;  %s3771_s21 = smov 48  }
 0x5ac   : > { %v970_v62 = vpop.f32.mrb[10].mxu0 }
 0x5ad   : > { %v2751_v63 = vpop.f32.mrb[11].mxu0 }
 0x5ce   : > { %v1079_v2 = vpop.f32.mrb[12].mxu0 }
 0x5cf   : > { %1202 = vrot.lane.b32.xlu1 %v1079_v2, %s3740_s29  ;;  %v2762_v3 = vpop.f32.mrb[13].mxu0  ;;  %s3770_s29 = smov 56  }
 0x5d0   : > { %v1082_v4 = vpop.f32.mrb[14].mxu0 }
 0x5d1   : > { %v2763_v5 = vpop.f32.mrb[15].mxu0 }
 0x5d6   : > { %v1191_v6 = vpop.f32.mrb[16].mxu0 }
 0x5d7   : > { %1206 = vrot.lane.b32.xlu0 %v1191_v6, %s3739_s27  ;;  %v2774_v7 = vpop.f32.mrb[17].mxu0  ;;  %s3765_s27 = smov 80  }
 0x5d8   : > { %v1194_v9 = vpop.f32.mrb[18].mxu0 }
 0x5d9   : > { %v2775_v10 = vpop.f32.mrb[19].mxu0 }
 0x61d   : > { %v1199_v11 = vpop.permute.xlu0 %1198 }
 0x61e   : > { %v1209_v13 = vsel %vm745_vm2, %v855_v56, %v1199_v11 }
 0x641   : > { %v1203_v12 = vpop.permute.xlu1 %1202 }
 0x642   : > { %v1211_v14 = vsel %vm1210_vm4, %v1209_v13, %v1203_v12 }
 0x649   : > { %v1207_v15 = vpop.permute.xlu0 %1206 }
 0x64a   : > { %v1213_v16 = vsel %vm1212_vm5, %v1211_v14, %v1207_v15  ;;  %v2969_v14 = vld [vmem:[%s3758_s3 + $0x10] sm:$0xff]   ;;  %v2970_v15 = vld [vmem:[%s3758_s3 + $0x18] sm:$0xff]  }
 0x64b   : > { %v1218_v17 = vpack.c.bf16 %v1213_v16, %v1213_v16 }
 0x64d   : > { %2781 = vmatmul.mubr.msk.bf16.vlgmr.msra.gmra.mrb[16].mxu1 %vm642_vm0, %v1218_v17 }
 0x64e   : > { %2800 = vmatprep.mubr.msk.bf16.mxu1 %vm3100_vm1, %v3099_v8  ;;  %2793 = vmatpush3.bf16.msra.mxu1 %v2965_v43 }
 0x64f   : > { %2794 = vmatprep.subr.bf16.mxu1 %v3099_v8 }
 0x652   : > { %2795 = vmatpush3.bf16.msra.mxu1 %v2966_v45 }
 0x653   : > { %2796 = vmatprep.subr.bf16.mxu1 %v3099_v8 }
 0x656   : > { %2797 = vmatpush3.bf16.msra.mxu1 %v2967_v46 }
 0x657   : > { %2798 = vmatprep.subr.bf16.mxu1 %v3099_v8 }
 0x65a   : > { %2799 = vmatpush3.bf16.msra.mxu1 %v2968_v47 }
 0x65b   : > { %2818 = vmatprep.subr.bf16.mxu1 %v3099_v8 }
 0x720   : > { %v1275_v20 = vpop.f32.mrb[16].mxu1 }
 0x721   : > { %v1276_v21 = vadd.f32 %v2569_v19, %v1275_v20  ;;  %v2782_v22 = vpop.f32.mrb[17].mxu1 }
 0x722   : > { %v1278_v23 = vpop.f32.mrb[18].mxu1 }
 0x723   : > { %v2783_v24 = vpop.f32.mrb[19].mxu1  ;;  %v1281_v26 = vadd.f32 %v1276_v21, %v3299_v18  ;;  %v2585_v21 = vld [vmem:[%s3719_s14] ss:$0 sm:$0xff] }
 0x724   : > { %v2586_v23 = vld [vmem:[%s3720_s15] ss:$0 sm:$0xff] }
 0x725   : > { %v1284_v27 = vsel %vm642_vm0, %v1281_v26, 0.0 }
 0x726   : > { %1285 = vadd.xlane.f32.xlu1 %v1284_v27 }
 0x7b3   : > { %v1286_v28 = vpop.xlane.xlu1 %1285 }
 0x7b4   : > { %v1287_v29 = vmul.f32 0.03125, %v1286_v28  ;;  %v2592_v28 = vld [vmem:[%s3761_s5 + $0x1] ss:$0 sm:$0xff] }
 0x7b6   : > { %v1288_v30 = vsub.f32 %v1281_v26, %v1287_v29 }
 0x7b8   : > { %v1289_v31 = vmul.f32 %v1288_v30, %v1288_v30 }
 0x7ba   : > { %v1290_v32 = vsel %vm642_vm0, %v1289_v31, 0.0 }
 0x7bb   : > { %1291 = vadd.xlane.f32.xlu0 %v1290_v32 }
 0x848   : > { %v1292_v18 = vpop.xlane.xlu0 %1291 }
 0x849   : > { %v1293_v35 = vmul.f32 0.03125, %v1292_v18 }
 0x84b   : > { %v1294_v36 = vadd.f32 1e-12, %v1293_v35 }
 0x84d   : > { %3001 = vrsqrt.f32 %v1294_v36 }
 0x857   : > { %v3002_v37 = vpop.eup %3001 }
 0x858   : > { %v1296_v25 = vmul.f32 %v3002_v37, %v1288_v30 }
 0x85a   : > { %v1303_v40 = vmul.f32 %v2573_v38, %v1296_v25 }
 0x85c   : > { %v1310_v41 = vadd.f32 %v2574_v39, %v1303_v40 }
 0x85e   : > { %v1315_v42 = vpack.c.bf16 %v1310_v41, %v1310_v41 }
 0x860   : > { %2789 = vmatmul.mubr.msk.bf16.vlgmr.msra.gmra.mrb[20].mxu0 %vm642_vm0, %v1315_v42 }
 0x861   : > { %2808 = vmatprep.mubr.msk.bf16.mxu0 %vm3100_vm1, %v3099_v8  ;;  %2805 = vmatpush3.bf16.msra.mxu0 %v2969_v14 }
 0x862   : > { %2806 = vmatprep.subr.bf16.mxu0 %v3099_v8 }
 0x865   : > { %2807 = vmatpush3.bf16.msra.mxu0 %v2970_v15 }
 0x866   : > { %2812 = vmatprep.subr.bf16.mxu0 %v3099_v8 }
 0x933   : > { %v1372_v49 = vpop.f32.mrb[20].mxu0 }
 0x934   : > { %v1373_v50 = vadd.f32 %v2575_v48, %v1372_v49  ;;  %v2790_v51 = vpop.f32.mrb[21].mxu0 }
 0x935   : > { %v1375_v52 = vpop.f32.mrb[22].mxu0 }
 0x936   : > { %v1379_v53 = vmul.f32 0.044715, %v1373_v50  ;;  %v2791_v54 = vpop.f32.mrb[23].mxu0  ;;  %v1378_v60 = vmul.f32 0.5, %v1373_v50 }
 0x938   : > { %v1380_v55 = vmul.f32 %v1379_v53, %v1373_v50 }
 0x93a   : > { %v1381_v56 = vmul.f32 %v1380_v55, %v1373_v50 }
 0x93c   : > { %v1382_v57 = vadd.f32 %v1381_v56, %v1373_v50 }
 0x93e   : > { %v1383_v58 = vmul.f32 0.7978846, %v1382_v57 }
 0x940   : > { %3003 = vtanh.f32 %v1383_v58 }
 0x94a   : > { %v3004_v59 = vpop.eup %3003 }
 0x94b   : > { %v1385_v61 = vadd.f32 1.0, %v3004_v59 }
 0x94d   : > { %v1386_v62 = vmul.f32 %v1385_v61, %v1378_v60 }
 0x94f   : > { %v1395_v63 = vpack.c.bf16 %v1386_v62, %v1386_v62 }
 0x951   : > { %2801 = vmatmul.mubr.msk.bf16.vlgmr.msra.gmra.mrb[20].mxu1 %vm1427_vm6, %v1395_v63 }
 0x952   : > { %2820 = vmatprep.mubr.msk.bf16.mxu1 %vm3100_vm1, %v3099_v8 }
 0xa24   : > { %v1465_v1 = vpop.f32.mrb[20].mxu1 }
 0xa25   : > { %v1466_v2 = vadd.f32 %v2579_v0, %v1465_v1  ;;  %v2802_v3 = vpop.f32.mrb[21].mxu1 }
 0xa26   : > { %v1468_v4 = vpop.f32.mrb[22].mxu1 }
 0xa27   : > { %v2803_v5 = vpop.f32.mrb[23].mxu1  ;;  %v1471_v6 = vadd.f32 %v1466_v2, %v1310_v41 }
 0xa29   : > { %v1474_v7 = vsel %vm642_vm0, %v1471_v6, 0.0 }
 0xa2a   : > { %1475 = vadd.xlane.f32.xlu0 %v1474_v7 }
 0xab7   : > { %v1476_v9 = vpop.xlane.xlu0 %1475 }
 0xab8   : > { %v1477_v10 = vmul.f32 0.03125, %v1476_v9 }
 0xaba   : > { %v1478_v11 = vsub.f32 %v1471_v6, %v1477_v10 }
 0xabc   : > { %v1479_v12 = vmul.f32 %v1478_v11, %v1478_v11 }
 0xabe   : > { %v1480_v13 = vsel %vm642_vm0, %v1479_v12, 0.0 }
 0xabf   : > { %1481 = vadd.xlane.f32.xlu1 %v1480_v13 }
 0xb4c   : > { %v1482_v16 = vpop.xlane.xlu1 %1481 }
 0xb4d   : > { %v1483_v17 = vmul.f32 0.03125, %v1482_v16 }
 0xb4f   : > { %v1484_v19 = vadd.f32 1e-12, %v1483_v17 }
 0xb51   : > { %3005 = vrsqrt.f32 %v1484_v19 }
 0xb5b   : > { %v3006_v20 = vpop.eup %3005 }
 0xb5c   : > { %v1486_v22 = vmul.f32 %v3006_v20, %v1478_v11 }
 0xb5e   : > { %v1493_v24 = vmul.f32 %v2585_v21, %v1486_v22 }
 0xb60   : > { %v3473_v26 = vadd.f32 %v2586_v23, %v1493_v24 }
 0xb62   : > { %v1506_v27 = vpack.c.bf16 %v3473_v26, %v3473_v26 }
 0xb64   : > { %2809 = vmatmul.mubr.msk.bf16.vlgmr.msra.gmra.mrb[24].mxu0 %vm642_vm0, %v1506_v27 }
 0xb65   : > { %2814 = vmatprep.mubr.msk.bf16.mxu0 %vm3100_vm1, %v3099_v8 }
 0xc37   : > { %v1564_v29 = vpop.f32.mrb[24].mxu0 }
 0xc38   : > { %v1565_v30 = vadd.f32 %v2592_v28, %v1564_v29  ;;  %v2810_v31 = vpop.f32.mrb[25].mxu0 }
 0xc39   : > { %v1567_v32 = vpop.f32.mrb[26].mxu0 }
 0xc3a   : > { %v3483_v33 = vpack.c.bf16 %v1565_v30, %v1565_v30  ;;  %v2811_v34 = vpop.f32.mrb[27].mxu0 }
 0xc3c   : > { %1684 = vrot.lane.b32.xlu1 %v3483_v33, %s3103_s25  ;;  %1572 = vrot.lane.b32.xlu0 %v3483_v33, %s3763_s0  ;;  %s3769_s25 = smov 64   ;;  %s3772_s0 = smov 40  }
 0xc40   : > { %1682 = vrot.lane.b32.xlu1 %v3483_v33, %s3764_s30  ;;  %1796 = vrot.lane.b32.xlu0 %v3483_v33, %s3765_s27  ;;  %s3773_s30 = smov 8   ;;  %s2651_s27 = sshll.u32 %s3242_s2, 4 }
 0xc41   : > { %s3115_s2 = smov [#allocation2]  }
 0xc42   : > { %s3039_s3 = sshll.u32 %s3115_s2, 4  ;;  %s3040_s3 = int_to_ptr.vmem [resolvable:$false] %s3039_s3 }
 0xc43   : > { %s3041_s5 = scalar_lea.vmem %s3040_s3, 32 }
 0xc44   : > { %1794 = vrot.lane.b32.xlu1 %v3483_v33, %s3766_s26  ;;  %1908 = vrot.lane.b32.xlu0 %v3483_v33, %s3767_s23 }
 0xc48   : > { %1906 = vrot.lane.b32.xlu1 %v3483_v33, %s3768_s28 }
 0xcae   : > { %v1573_v18 = vpop.permute.xlu0 %1572  ;;  %v1685_v36 = vpop.permute.xlu1 %1684 }
 0xcaf   : > { %v1578_v35 = vsel %vm745_vm2, %v1573_v18, 0  ;;  %v1690_v37 = vsel %vm745_vm2, %v1685_v36, 0 }
 0xcb0   : > { %2813 = vmatpush3.bf16.xpose.msra.mxu0 %v1578_v35 }
 0xcb1   : > { %2824 = vmatprep.subr.bf16.mxu0 %v3099_v8 }
 0xcb2   : > { %v1797_v38 = vpop.permute.xlu0 %1796  ;;  %v1683_v25 = vpop.permute.xlu1 %1682 }
 0xcb3   : > { %v1802_v39 = vsel %vm745_vm2, %v1797_v38, 0 }
 0xcb6   : > { %v1909_v40 = vpop.permute.xlu0 %1908  ;;  %v1795_v41 = vpop.permute.xlu1 %1794 }
 0xcb7   : > { %2815 = vmatmul.mubr.msk.bf16.vlgmr.msra.gmra.mrb[28].mxu0 %vm745_vm2, %v3483_v33  ;;  %v1914_v42 = vsel %vm745_vm2, %v1909_v40, 0 }
 0xcb8   : > { %2825 = vmatpush3.bf16.xpose.msra.mxu0 %v1690_v37  ;;  %2826 = vmatprep.mubr.msk.bf16.mxu0 %vm3100_vm1, %v3099_v8 }
 0xcb9   : > { %2836 = vmatprep.subr.bf16.mxu0 %v3099_v8 }
 0xcba   : > { %v1907_v43 = vpop.permute.xlu1 %1906 }
 0xcbf   : > { %2827 = vmatmul.mubr.msk.bf16.vlgmr.msra.gmra.mrb[32].mxu0 %vm745_vm2, %v1683_v25 }
 0xcc0   : > { %2837 = vmatpush3.bf16.xpose.msra.mxu0 %v1802_v39  ;;  %2838 = vmatprep.mubr.msk.bf16.mxu0 %vm3100_vm1, %v3099_v8 }
 0xcc1   : > { %2848 = vmatprep.subr.bf16.mxu0 %v3099_v8 }
 0xcc7   : > { %2839 = vmatmul.mubr.msk.bf16.vlgmr.msra.gmra.mrb[36].mxu0 %vm745_vm2, %v1795_v41 }
 0xcc8   : > { %2849 = vmatpush3.bf16.xpose.msra.mxu0 %v1914_v42  ;;  %2850 = vmatprep.mubr.msk.bf16.mxu0 %vm3100_vm1, %v3099_v8 }
 0xcc9   : > { %2860 = vmatprep.subr.bf16.mxu0 %v3099_v8 }
 0xccf   : > { %2851 = vmatmul.mubr.msk.bf16.vlgmr.msra.gmra.mrb[40].mxu0 %vm745_vm2, %v1907_v43 }
 0xcd0   : > { %2864 = vmatprep.mubr.msk.bf16.mxu0 %vm3100_vm1, %v3099_v8 }
 0xd8a   : > { %v1614_v45 = vpop.f32.mrb[28].mxu0 }
 0xd8b   : > { %v1620_v46 = vmul.f32 0.35355338, %v1614_v45  ;;  %v2816_v47 = vpop.f32.mrb[29].mxu0 }
 0xd8c   : > { %v1617_v48 = vpop.f32.mrb[30].mxu0 }
 0xd8d   : > { %v2817_v49 = vpop.f32.mrb[31].mxu0  ;;  %v1621_v50 = vadd.f32 %v1620_v46, %v3350_v44 }
 0xd8f   : > { %v1622_v51 = vsel %vm745_vm2, %v1621_v50, -inf }
 0xd90   : > { %1623 = vmax.xlane.f32.xlu0 %v1622_v51 }
 0xd92   : > { %v1726_v52 = vpop.f32.mrb[32].mxu0 }
 0xd93   : > { %v1732_v53 = vmul.f32 0.35355338, %v1726_v52  ;;  %v2828_v54 = vpop.f32.mrb[33].mxu0 }
 0xd94   : > { %v1729_v55 = vpop.f32.mrb[34].mxu0 }
 0xd95   : > { %v2829_v56 = vpop.f32.mrb[35].mxu0  ;;  %v1733_v57 = vadd.f32 %v1732_v53, %v3350_v44 }
 0xd97   : > { %v1734_v58 = vsel %vm745_vm2, %v1733_v57, -inf }
 0xd98   : > { %1735 = vmax.xlane.f32.xlu1 %v1734_v58 }
 0xd9a   : > { %v1838_v59 = vpop.f32.mrb[36].mxu0 }
 0xd9b   : > { %v1844_v60 = vmul.f32 0.35355338, %v1838_v59  ;;  %v2840_v61 = vpop.f32.mrb[37].mxu0 }
 0xd9c   : > { %v1841_v62 = vpop.f32.mrb[38].mxu0 }
 0xd9d   : > { %v2841_v63 = vpop.f32.mrb[39].mxu0  ;;  %v1845_v0 = vadd.f32 %v1844_v60, %v3350_v44 }
 0xd9e   : > { %v2971_v63 = vld [vmem:[%s3711_s6 + $0x10] sm:$0xff]  }
 0xd9f   : > { %v1846_v1 = vsel %vm745_vm2, %v1845_v0, -inf  ;;  %2861 = vmatpush3.bf16.msra.mxu0 %v2971_v63 }
 0xda0   : > { %1847 = vmax.xlane.f32.xlu0 %v1846_v1  ;;  %2862 = vmatprep.subr.bf16.mxu0 %v3099_v8 }
 0xda2   : > { %v1950_v2 = vpop.f32.mrb[40].mxu0 }
 0xda3   : > { %v1956_v3 = vmul.f32 0.35355338, %v1950_v2  ;;  %v2852_v4 = vpop.f32.mrb[41].mxu0 }
 0xda4   : > { %v1953_v5 = vpop.f32.mrb[42].mxu0 }
 0xda5   : > { %v2853_v6 = vpop.f32.mrb[43].mxu0  ;;  %v1957_v7 = vadd.f32 %v1956_v3, %v3350_v44 }
 0xda7   : > { %v1958_v9 = vsel %vm745_vm2, %v1957_v7, -inf }
 0xda8   : > { %1959 = vmax.xlane.f32.xlu0 %v1958_v9 }
 0xe1d   : > { %v1624_v10 = vpop.xlane.xlu0 %1623 }
 0xe1e   : > { %v1625_v11 = vsub.f32 %v1621_v50, %v1624_v10 }
 0xe20   : > { %v1626_v12 = vmul.f32 1.442695, %v1625_v11 }
 0xe22   : > { %3007 = vpow2.f32 %v1626_v12 }
 0xe25   : > { %v1736_v13 = vpop.xlane.xlu1 %1735 }
 0xe26   : > { %v1737_v14 = vsub.f32 %v1733_v57, %v1736_v13 }
 0xe28   : > { %v1738_v15 = vmul.f32 1.442695, %v1737_v14 }
 0xe2a   : > { %3009 = vpow2.f32 %v1738_v15 }
 0xe2c   : > { %v3008_v16 = vpop.eup %3007 }
 0xe2d   : > { %v1628_v17 = vsel %vm745_vm2, %v3008_v16, 0.0  ;;  %v1848_v19 = vpop.xlane.xlu0 %1847 }
 0xe2e   : > { %1629 = vadd.xlane.f32.xlu1 %v1628_v17  ;;  %v1849_v28 = vsub.f32 %v1845_v0, %v1848_v19  ;;  %v2972_v0 = vld [vmem:[%s3711_s6 + $0x18] sm:$0xff]   ;;  %v2609_v17 = vld [vmem:[%s3712_s7 + $0x1] ss:$0 sm:$0xff] }
 0xe2f   : > { %2863 = vmatpush3.bf16.msra.mxu0 %v2972_v0 }
 0xe30   : > { %v1850_v29 = vmul.f32 1.442695, %v1849_v28  ;;  %2876 = vmatprep.subr.bf16.mxu0 %v3099_v8 }
 0xe34   : > { %v3010_v20 = vpop.eup %3009 }
 0xe35   : > { %v1960_v21 = vpop.xlane.xlu0 %1959  ;;  %v1740_v44 = vsel %vm745_vm2, %v3010_v20, 0.0 }
 0xe36   : > { %v1961_v22 = vsub.f32 %v1957_v7, %v1960_v21  ;;  %1741 = vadd.xlane.f32.xlu0 %v1740_v44 }
 0xe38   : > { %v1962_v23 = vmul.f32 1.442695, %v1961_v22 }
 0xe3a   : > { %3011 = vpow2.f32 %v1962_v23 }
 0xe3b   : > { %3013 = vpow2.f32 %v1850_v29 }
 0xe3f   : > { %1634 = vrot.lane.b32.xlu1 %v3483_v33, %s3769_s25  ;;  %s3774_s25 = smov 16  }
 0xe44   : > { %v3012_v24 = vpop.eup %3011 }
 0xe45   : > { %v1964_v27 = vsel %vm745_vm2, %v3012_v24, 0.0  ;;  %v3014_v30 = vpop.eup %3013 }
 0xe46   : > { %1965 = vadd.xlane.f32.xlu0 %v1964_v27  ;;  %v1852_v31 = vsel %vm745_vm2, %v3014_v30, 0.0 }
 0xe5c   : > { %1746 = vrot.lane.b32.xlu0 %v3483_v33, %s3770_s29  ;;  %s3775_s29 = smov 24  }
 0xe63   : > { %1853 = vadd.xlane.f32.xlu1 %v1852_v31 }
 0xe74   : > { %1858 = vrot.lane.b32.xlu1 %v3483_v33, %s3771_s21 }
 0xe78   : > { %1970 = vrot.lane.b32.xlu1 %v3483_v33, %s3772_s0 }
 0xebb   : > { %v1630_v32 = vpop.xlane.xlu1 %1629 }
 0xebc   : > { %3015 = vrcp.f32 %v1630_v32  ;;  %v2973_v32 = vld [vmem:[%s3715_s10 + $0x10] sm:$0xff]  }
 0xebf   : > { %v1635_v34 = vpop.permute.xlu1 %1634 }
 0xec0   : > { %v1640_v18 = vsel %vm817_vm3, %v1635_v34, 0  ;;  %v2974_v34 = vld [vmem:[%s3715_s10 + $0x18] sm:$0xff]  }
 0xec1   : > { %2819 = vmatpush3.bf16.msra.mxu1 %v1640_v18 }
 0xec2   : > { %2830 = vmatprep.subr.bf16.mxu1 %v3099_v8 }
 0xec3   : > { %v1742_v36 = vpop.xlane.xlu0 %1741 }
 0xec4   : > { %3017 = vrcp.f32 %v1742_v36 }
 0xec6   : > { %v3016_v35 = vpop.eup %3015 }
 0xec7   : > { %v1632_v37 = vmul.f32 %v3016_v35, %v3008_v16 }
 0xec9   : > { %v1633_v38 = vpack.c.bf16 %v1632_v37, %v1632_v37  ;;  %v2615_v37 = vld [vmem:[%s3713_s8 + $0x1] ss:$0 sm:$0xff] }
 0xecb   : > { %2821 = vmatmul.mubr.msk.bf16.vlgmr.msra.gmra.mrb[24].mxu1 %vm745_vm2, %v1633_v38 }
 0xecc   : > { %2832 = vmatprep.mubr.msk.bf16.mxu1 %vm3100_vm1, %v3099_v8 }
 0xece   : > { %v3018_v25 = vpop.eup %3017 }
 0xecf   : > { %v1744_v39 = vmul.f32 %v3018_v25, %v3010_v20  ;;  %v2616_v25 = vld [vmem:[%s3714_s9 + $0x1] ss:$0 sm:$0xff] }
 0xed1   : > { %v1745_v42 = vpack.c.bf16 %v1744_v39, %v1744_v39 }
 0xed3   : > { %v1966_v33 = vpop.xlane.xlu0 %1965 }
 0xed7   : > { %v1747_v40 = vpop.permute.xlu0 %1746 }
 0xed8   : > { %v1752_v41 = vsel %vm817_vm3, %v1747_v40, 0 }
 0xed9   : > { %2831 = vmatpush3.bf16.msra.mxu1 %v1752_v41  ;;  %v2975_v41 = vld [vmem:[%s3717_s12 + $0x20] sm:$0xff]  }
 0xeda   : > { %2842 = vmatprep.subr.bf16.mxu1 %v3099_v8 }
 0xedc   : > { %2833 = vmatmul.mubr.msk.bf16.vlgmr.msra.gmra.mrb[28].mxu1 %vm745_vm2, %v1745_v42  ;;  %v2976_v42 = vld [vmem:[%s3717_s12 + $0x28] sm:$0xff]  }
 0xedd   : > { %2844 = vmatprep.mubr.msk.bf16.mxu1 %vm3100_vm1, %v3099_v8 }
 0xef0   : > { %v1854_v43 = vpop.xlane.xlu1 %1853 }
 0xef1   : > { %3019 = vrcp.f32 %v1854_v43  ;;  %v2977_v43 = vld [vmem:[%s3717_s12 + $0x30] sm:$0xff]  }
 0xef2   : > { %3021 = vrcp.f32 %v1966_v33 }
 0xef4   : > { %v1859_v45 = vpop.permute.xlu1 %1858 }
 0xef5   : > { %v1864_v46 = vsel %vm817_vm3, %v1859_v45, 0  ;;  %v2978_v45 = vld [vmem:[%s3717_s12 + $0x38] sm:$0xff]  }
 0xef6   : > { %2843 = vmatpush3.bf16.msra.mxu1 %v1864_v46  ;;  %v2622_v46 = vld [vmem:[%s3716_s11 + $0x1] ss:$0 sm:$0xff] }
 0xef7   : > { %2854 = vmatprep.subr.bf16.mxu1 %v3099_v8 }
 0xef8   : > { %v1971_v49 = vpop.permute.xlu1 %1970 }
 0xef9   : > { %v1976_v52 = vsel %vm817_vm3, %v1971_v49, 0 }
 0xefb   : > { %v3020_v47 = vpop.eup %3019 }
 0xefc   : > { %v1856_v48 = vmul.f32 %v3020_v47, %v3014_v30  ;;  %v3022_v51 = vpop.eup %3021 }
 0xefd   : > { %v1968_v53 = vmul.f32 %v3022_v51, %v3012_v24 }
 0xefe   : > { %v1857_v50 = vpack.c.bf16 %v1856_v48, %v1856_v48 }
 0xeff   : > { %v1969_v54 = vpack.c.bf16 %v1968_v53, %v1968_v53 }
 0xf00   : > { %2845 = vmatmul.mubr.msk.bf16.vlgmr.msra.gmra.mrb[32].mxu1 %vm745_vm2, %v1857_v50 }
 0xf01   : > { %2855 = vmatpush3.bf16.msra.mxu1 %v1976_v52  ;;  %2856 = vmatprep.mubr.msk.bf16.mxu1 %vm3100_vm1, %v3099_v8 }
 0xf02   : > { %2868 = vmatprep.subr.bf16.mxu1 %v3099_v8 }
 0xf08   : > { %2857 = vmatmul.mubr.msk.bf16.vlgmr.msra.gmra.mrb[36].mxu1 %vm745_vm2, %v1969_v54 }
 0xf09   : > { %2872 = vmatprep.mubr.msk.bf16.mxu1 %vm3100_vm1, %v3099_v8  ;;  %2869 = vmatpush3.bf16.msra.mxu1 %v2973_v32 }
 0xf0a   : > { %2870 = vmatprep.subr.bf16.mxu1 %v3099_v8 }
 0xf0d   : > { %2871 = vmatpush3.bf16.msra.mxu1 %v2974_v34 }
 0xf0e   : > { %2888 = vmatprep.subr.bf16.mxu1 %v3099_v8 }
 0xf9e   : > { %v1676_v55 = vpop.f32.mrb[24].mxu1 }
 0xf9f   : > { %v2822_v56 = vpop.f32.mrb[25].mxu1 }
 0xfa0   : > { %v1679_v57 = vpop.f32.mrb[26].mxu1 }
 0xfa1   : > { %v2823_v58 = vpop.f32.mrb[27].mxu1 }
 0xfaf   : > { %v1788_v59 = vpop.f32.mrb[28].mxu1 }
 0xfb0   : > { %2019 = vrot.lane.b32.xlu0 %v1788_v59, %s3773_s30  ;;  %v2834_v60 = vpop.f32.mrb[29].mxu1  ;;  %s629_s30 = sand.u32 1, %s3089_s22  }
 0xfb1   : > { %v1791_v61 = vpop.f32.mrb[30].mxu1  ;;  %s630_s26 = scalar_lea.vmem [#allocation2], %s629_s30  ;;  %s2474_s21 = scalar_lea.sflag [#allocation3], %s629_s30 }
 0xfb2   : > { %v2835_v62 = vpop.f32.mrb[31].mxu1  ;;  %s2486_s23 = sshll.u32 %s630_s26, 4  ;;  %s3664_s23 = int_to_ptr.vmem [resolvable:$true] %s2486_s23 }
 0xfb3   : > { %v2635_v62 = vld [vmem:[%s3718_s13 + $0x1] ss:$0 sm:$0xff]  ;;  %s3035_s0 = scalar_lea.vmem %s3664_s23, 16  ;;  %p3042_p0 = scmp.lt.s32.totalorder %s3664_s23, %s3040_s3 }
 0xfb4   : > { %p3036_p11 = scmp.ne.s32.totalorder %s3664_s23, %s3035_s0  ;;  %p3043_p1 = scmp.lt.s32.totalorder %s3041_s5, %s3035_s0 }
 0xfb6   : > { %p3037_p12 = pnand %p3036_p11, %p3259_p5  ;;  %p3044_p2 = por %p3043_p1, %p3042_p0 }
 0xfb8   : > { %p3038_p13 = pneg %p3037_p12 }
 0xfba   : > { %p3045_p3 = pnand %p3044_p2, %p3038_p13 }
 0xfd3   : > { %v1900_v1 = vpop.f32.mrb[32].mxu1 }
 0xfd4   : > { %2023 = vrot.lane.b32.xlu1 %v1900_v1, %s3774_s25  ;;  %v2846_v2 = vpop.f32.mrb[33].mxu1 }
 0xfd5   : > { %v1903_v3 = vpop.f32.mrb[34].mxu1 }
 0xfd6   : > { %v2847_v4 = vpop.f32.mrb[35].mxu1 }
 0xfdb   : > { %v2012_v5 = vpop.f32.mrb[36].mxu1 }
 0xfdc   : > { %2027 = vrot.lane.b32.xlu0 %v2012_v5, %s3775_s29  ;;  %v2858_v6 = vpop.f32.mrb[37].mxu1  ;;  %s3662_s29 = scalar_lea.hbm %s3725_s20, %s2651_s27 }
 0xfdd   : > { %v2015_v7 = vpop.f32.mrb[38].mxu1 }
 0xfde   : > { %v2859_v9 = vpop.f32.mrb[39].mxu1 }
0x1022   : > { %v2020_v10 = vpop.permute.xlu0 %2019 }
0x1023   : > { %v2030_v12 = vsel %vm745_vm2, %v1676_v55, %v2020_v10 }
0x1046   : > { %v2024_v11 = vpop.permute.xlu1 %2023 }
0x1047   : > { %v2031_v13 = vsel %vm1210_vm4, %v2030_v12, %v2024_v11  ;;  %v2979_v12 = vld [vmem:[%s3721_s16] sm:$0xff]  }
0x104e   : > { %v2028_v14 = vpop.permute.xlu0 %2027 }
0x104f   : > { %v2032_v15 = vsel %vm1212_vm5, %v2031_v13, %v2028_v14  ;;  %v2980_v13 = vld [vmem:[%s3721_s16 + $0x8] sm:$0xff]  }
0x1050   : > { %v2038_v16 = vpack.c.bf16 %v2032_v15, %v2032_v15 }
0x1052   : > { %2865 = vmatmul.mubr.msk.bf16.vlgmr.msra.gmra.mrb[44].mxu0 %vm642_vm0, %v2038_v16 }
0x1053   : > { %2884 = vmatprep.mubr.msk.bf16.mxu0 %vm3100_vm1, %v3099_v8  ;;  %2877 = vmatpush3.bf16.msra.mxu0 %v2975_v41 }
0x1054   : > { %2878 = vmatprep.subr.bf16.mxu0 %v3099_v8 }
0x1057   : > { %2879 = vmatpush3.bf16.msra.mxu0 %v2976_v42 }
0x1058   : > { %2880 = vmatprep.subr.bf16.mxu0 %v3099_v8 }
0x105b   : > { %2881 = vmatpush3.bf16.msra.mxu0 %v2977_v43 }
0x105c   : > { %2882 = vmatprep.subr.bf16.mxu0 %v3099_v8 }
0x105f   : > { %2883 = vmatpush3.bf16.msra.mxu0 %v2978_v45 }
0x1125   : > { %v2096_v19 = vpop.f32.mrb[44].mxu0 }
0x1126   : > { %v2097_v20 = vadd.f32 %v2609_v17, %v2096_v19  ;;  %v2866_v21 = vpop.f32.mrb[45].mxu0  ;;  %v2643_v19 = vld [vmem:[%s3719_s14 + $0x1] ss:$0 sm:$0xff] }
0x1127   : > { %v2099_v44 = vpop.f32.mrb[46].mxu0  ;;  %v2644_v21 = vld [vmem:[%s3720_s15 + $0x1] ss:$0 sm:$0xff] }
0x1128   : > { %v2867_v22 = vpop.f32.mrb[47].mxu0  ;;  %v2102_v23 = vadd.f32 %v2097_v20, %v3473_v26 }
0x112a   : > { %v2107_v24 = vsel %vm642_vm0, %v2102_v23, 0.0 }
0x112b   : > { %2108 = vadd.xlane.f32.xlu1 %v2107_v24  ;;  %v2981_v24 = vld [vmem:[%s3723_s18] sm:$0xff]  }
0x11b8   : > { %v2109_v27 = vpop.xlane.xlu1 %2108 }
0x11b9   : > { %v2110_v28 = vmul.f32 0.03125, %v2109_v27  ;;  %v2982_v27 = vld [vmem:[%s3723_s18 + $0x8] sm:$0xff]  }
0x11bb   : > { %v2111_v29 = vsub.f32 %v2102_v23, %v2110_v28  ;;  %v2334_v28 = vld [vmem:[%s3722_s17] sm:$0x1] }
0x11bd   : > { %v2112_v30 = vmul.f32 %v2111_v29, %v2111_v29 }
0x11bf   : > { %v2113_v31 = vsel %vm642_vm0, %v2112_v30, 0.0 }
0x11c0   : > { %2114 = vadd.xlane.f32.xlu0 %v2113_v31 }
0x124d   : > { %v2115_v26 = vpop.xlane.xlu0 %2114 }
0x124e   : > { %v2116_v18 = vmul.f32 0.03125, %v2115_v26 }
0x1250   : > { %v2117_v35 = vadd.f32 1e-12, %v2116_v18 }
0x1252   : > { %3023 = vrsqrt.f32 %v2117_v35 }
0x125c   : > { %v3024_v36 = vpop.eup %3023 }
0x125d   : > { %v2119_v38 = vmul.f32 %v3024_v36, %v2111_v29 }
0x125f   : > { %v2126_v33 = vmul.f32 %v2615_v37, %v2119_v38 }
0x1261   : > { %v2133_v39 = vadd.f32 %v2616_v25, %v2126_v33 }
0x1263   : > { %v2139_v40 = vpack.c.bf16 %v2133_v39, %v2133_v39 }
0x1265   : > { %2873 = vmatmul.mubr.msk.bf16.vlgmr.msra.gmra.mrb[40].mxu1 %vm642_vm0, %v2139_v40  ;;  %v2404_v40 = vld [vmem:[%s3724_s19] sm:$0x1] }
0x1266   : > { %2892 = vmatprep.mubr.msk.bf16.mxu1 %vm3100_vm1, %v3099_v8  ;;  %2889 = vmatpush3.bf16.msra.mxu1 %v2979_v12 }
0x1267   : > { %2890 = vmatprep.subr.bf16.mxu1 %v3099_v8 }
0x126a   : > { %2891 = vmatpush3.bf16.msra.mxu1 %v2980_v13 }
0x126b   : > { %2896 = vmatprep.subr.bf16.mxu1 %v3099_v8 }
0x1338   : > { %v2197_v47 = vpop.f32.mrb[40].mxu1 }
0x1339   : > { %v2198_v48 = vadd.f32 %v2622_v46, %v2197_v47  ;;  %v2874_v49 = vpop.f32.mrb[41].mxu1 }
0x133a   : > { %v2200_v50 = vpop.f32.mrb[42].mxu1 }
0x133b   : > { %v2204_v51 = vmul.f32 0.044715, %v2198_v48  ;;  %v2875_v52 = vpop.f32.mrb[43].mxu1  ;;  %v2203_v58 = vmul.f32 0.5, %v2198_v48 }
0x133d   : > { %v2205_v53 = vmul.f32 %v2204_v51, %v2198_v48 }
0x133f   : > { %v2206_v54 = vmul.f32 %v2205_v53, %v2198_v48 }
0x1341   : > { %v2207_v55 = vadd.f32 %v2206_v54, %v2198_v48 }
0x1343   : > { %v2208_v56 = vmul.f32 0.7978846, %v2207_v55 }
0x1345   : > { %3025 = vtanh.f32 %v2208_v56 }
0x134f   : > { %v3026_v57 = vpop.eup %3025 }
0x1350   : > { %v2210_v59 = vadd.f32 1.0, %v3026_v57 }
0x1352   : > { %v2211_v60 = vmul.f32 %v2210_v59, %v2203_v58 }
0x1354   : > { %v2221_v61 = vpack.c.bf16 %v2211_v60, %v2211_v60 }
0x1356   : > { %2885 = vmatmul.mubr.msk.bf16.vlgmr.msra.gmra.mrb[48].mxu0 %vm1427_vm6, %v2221_v61 }
0x1429   : > { %v2291_v63 = vpop.f32.mrb[48].mxu0 }
0x142a   : > { %v2292_v0 = vadd.f32 %v2635_v62, %v2291_v63  ;;  %v2886_v1 = vpop.f32.mrb[49].mxu0 }
0x142b   : > { %v2294_v2 = vpop.f32.mrb[50].mxu0 }
0x142c   : > { %v2887_v3 = vpop.f32.mrb[51].mxu0  ;;  %v2297_v4 = vadd.f32 %v2292_v0, %v2133_v39 }
0x142e   : > { %v2302_v5 = vsel %vm642_vm0, %v2297_v4, 0.0 }
0x142f   : > { %2303 = vadd.xlane.f32.xlu0 %v2302_v5 }
0x14bc   : > { %v2304_v6 = vpop.xlane.xlu0 %2303 }
0x14bd   : > { %v2305_v7 = vmul.f32 0.03125, %v2304_v6 }
0x14bf   : > { %v2306_v9 = vsub.f32 %v2297_v4, %v2305_v7 }
0x14c1   : > { %v2307_v10 = vmul.f32 %v2306_v9, %v2306_v9 }
0x14c3   : > { %v2308_v11 = vsel %vm642_vm0, %v2307_v10, 0.0 }
0x14c4   : > { %2309 = vadd.xlane.f32.xlu1 %v2308_v11 }
0x1551   : > { %v2310_v14 = vpop.xlane.xlu1 %2309 }
0x1552   : > { %v2311_v15 = vmul.f32 0.03125, %v2310_v14 }
0x1554   : > { %v2312_v16 = vadd.f32 1e-12, %v2311_v15 }
0x1556   : > { %3027 = vrsqrt.f32 %v2312_v16 }
0x1560   : > { %v3028_v17 = vpop.eup %3027 }
0x1561   : > { %v2314_v20 = vmul.f32 %v3028_v17, %v2306_v9 }
0x1563   : > { %v2321_v44 = vmul.f32 %v2643_v19, %v2314_v20 }
0x1565   : > { %v2328_v22 = vadd.f32 %v2644_v21, %v2321_v44 }
0x1567   : > { %v2333_v23 = vpack.c.bf16 %v2328_v22, %v2328_v22 }
0x1569   : > { %2893 = vmatmul.mubr.msk.bf16.vlgmr.msra.gmra.mrb[44].mxu1 %vm642_vm0, %v2333_v23 }
0x156a   : > { %2900 = vmatprep.mubr.msk.bf16.mxu1 %vm3100_vm1, %v3099_v8  ;;  %2897 = vmatpush3.bf16.msra.mxu1 %v2981_v24 }
0x156b   : > { %2898 = vmatprep.subr.bf16.mxu1 %v3099_v8 }
0x156e   : > { %2899 = vmatpush3.bf16.msra.mxu1 %v2982_v27 }
0x163c   : > { %v2384_v29 = vpop.f32.mrb[44].mxu1 }
0x163d   : > { %v2385_v30 = vadd.f32 %v2384_v29, %v2334_v28  ;;  %v2894_v31 = vpop.f32.mrb[45].mxu1 }
0x163e   : > { %v2387_v32 = vpop.f32.mrb[46].mxu1 }
0x163f   : > { %v2391_v34 = vmul.f32 0.044715, %v2385_v30  ;;  %v2895_v26 = vpop.f32.mrb[47].mxu1  ;;  %v2390_v25 = vmul.f32 0.5, %v2385_v30 }
0x1641   : > { %v2392_v18 = vmul.f32 %v2391_v34, %v2385_v30 }
0x1643   : > { %v2393_v35 = vmul.f32 %v2392_v18, %v2385_v30 }
0x1645   : > { %v2394_v36 = vadd.f32 %v2393_v35, %v2385_v30 }
0x1647   : > { %v2395_v37 = vmul.f32 0.7978846, %v2394_v36 }
0x1649   : > { %3029 = vtanh.f32 %v2395_v37 }
0x1653   : > { %v3030_v38 = vpop.eup %3029 }
0x1654   : > { %v2397_v33 = vadd.f32 1.0, %v3030_v38 }
0x1656   : > { %v2398_v8 = vmul.f32 %v2397_v33, %v2390_v25 }
0x1658   : > { %v2403_v39 = vpack.c.bf16 %v2398_v8, %v2398_v8 }
0x165a   : > { %2901 = vmatmul.mubr.msk.bf16.vlgmr.msra.gmra.mrb[48].mxu1 %vm642_vm0, %v2403_v39 }
0x172d   : > { %v2454_v41 = vpop.f32.mrb[48].mxu1 }
0x172e   : > { %v2455_v42 = vadd.f32 %v2454_v41, %v2404_v40  ;;  %v2902_v43 = vpop.f32.mrb[49].mxu1 }
0x172f   : > { %v2457_v45 = vpop.f32.mrb[50].mxu1 }
0x1730   : > { %v2903_v46 = vpop.f32.mrb[51].mxu1  ;;  %v2461_v47 = vsel %vm2460_vm7, %v2455_v42, -inf }
0x1731   : > { %2462 = vmax.xlane.f32.xlu0 %v2461_v47 }
0x17be   : > { %v2463_v48 = vpop.xlane.xlu0 %2462 }
0x17bf   : > { %v2464_v49 = vsub.f32 %v2455_v42, %v2463_v48 }
0x17c1   : > { %v2465_v50 = vmul.f32 1.442695, %v2464_v49 }
0x17c3   : > { %3031 = vpow2.f32 %v2465_v50 }
0x17cd   : > { %v3032_v51 = vpop.eup %3031 }
0x17ce   : > { %v2467_v52 = vsel %vm2460_vm7, %v3032_v51, 0.0 }
0x17cf   : > { %2468 = vadd.xlane.f32.xlu1 %v2467_v52 }
0x185c   : > { %v2469_v53 = vpop.xlane.xlu1 %2468 }
0x185d   : > { %3033 = vrcp.f32 %v2469_v53 }
0x1867   : > { %v3034_v54 = vpop.eup %3033 }
0x1868   : > { %v2471_v55 = vmul.f32 %v3034_v54, %v3032_v51 }
0x186a   : > { %2472 = vst.msk [vmem:[%s630_s26] sm:$0x1] %vm2460_vm7, %v2471_v55 }
0x186b   : > { %3048 = shalt.err (!%p3045_p3)
}
0x186c   : > { %s3049_s30 = scalar_lea.hbm %s3662_s29, 16  ;;  %s3053_s28 = scalar_lea.hbm %s3725_s20, 32 }
0x186d   : > { %p3050_p4 = scmp.ne.s32.totalorder %s3662_s29, %s3049_s30  ;;  %p3054_p9 = scmp.lt.u32.totalorder %s3662_s29, %s3725_s20 }
0x186e   : > { %p3055_p10 = scmp.lt.u32.totalorder %s3053_s28, %s3049_s30  ;;  %p3057_p12 = scmp.lt.u32.totalorder %s3049_s30, %s3662_s29 }
0x186f   : > { %p3051_p7 = pnand %p3050_p4, %p3259_p5 }
0x1870   : > { %p3056_p11 = por %p3055_p10, %p3054_p9 }
0x1871   : > { %p3052_p8 = pneg %p3051_p7 }
0x1872   : > { %p3058_p13 = por %p3057_p12, %p3056_p11 }
0x1874   : > { %p3059_p0 = pnand %p3058_p13, %p3052_p8 }
0x1876   : > { %3062 = shalt.err (!%p3059_p0)
}
0x1877   : > { %2904 = dma.vmem_to_hbm [thread:$0]  (%p3259_p5), %s3664_s23, 16, %s3662_s29, %s2474_s21  }
0x1878 PF: > { %p2910_p1 = scmp.ge.s32.totalorder %s3097_s24, 2  ;;  %s2498_s0 = sand.u32 1, %s3085_s1  }
0x1879   : > { %s2499_s2 = scalar_lea.sflag [#allocation3], %s2498_s0 }
0x187a   : > { %p2907_p2 = pnand %p2910_p1, %p3263_p6 }
0x187c   : > { %3080 = dma.done.wait (!%p2907_p2), %s2499_s2, 16  }
0x187d   : > { %3082 = vsyncadd (!%p2907_p2), %s2499_s2, 4294967280  ;;  %s3777_s24 = sld [smem:[#allocation6_spill]]  ;;  %s3778_s30 = sld [smem:[#allocation5_spill]] }
0x187e   : > { %s3779_s23 = sld [smem:[#allocation7_spill]]  ;;  %s3780_s1 = smov %s3089_s22 }
0x1883   : > { %p30_p3 = scmp.ge.s32.totalorder %s3777_s24, 4   ;;  %s3781_s22 = smov %s3778_s30 }
0x1885   :  { %32 = sbr.rel (!%p30_p3) target bundleno = 10 (0xa), region = 150 }
0x188c   :  { %2503 = vsyncpa [#allocation3], 1 }
0x188d   :  { %2505 = vsyncpa [#allocation3 + $0x1], 1 }

</bundles_post_ra>
